<compile_context>
chip_gen: v5e
topology: v5e:2x2
jax: 0.10.0
libtpu: 0.0.40
codegen_flags: <defaults>
</compile_context>

<pallas_src>
import math
from functools import partial

import jax
import jax.numpy as jnp
from jax import lax
from jax.experimental import pallas as pl
from jax.experimental.pallas import tpu as pltpu


# -----------------------------------------------------------------------------
# Fused GEM kernel: FAM (collapsed) -> pair expansion -> ARM attention -> FFM+LN
# -----------------------------------------------------------------------------

def _gem_kernel(gf_ref, w_ref, aux_ref, out_ref, *, n_cls, num_heads, group, eps):
    f32, bf16 = jnp.float32, jnp.bfloat16
    Bblk, D = gf_ref.shape
    N = n_cls
    NN = N * N
    dh = D // num_heads
    scale = 1.0 / math.sqrt(dh)
    QM, KM = Bblk * NN, Bblk * N
    rows_per_b = NN // group

    # ---- packed weight slab (bf16, lane-dense) ------------------------------
    Wv_fam = w_ref[:, 0 * D:1 * D]
    Wo_fam = w_ref[:, 1 * D:2 * D]
    Wq_arm = w_ref[:, 2 * D:3 * D]
    Wk_arm = w_ref[:, 3 * D:4 * D]
    Wv_arm = w_ref[:, 4 * D:5 * D]
    Wo_arm = w_ref[:, 5 * D:6 * D]
    W1 = w_ref[:, 6 * D:10 * D]            # FFM lin1 (in, out) = (D, 4D)
    W2 = w_ref[:, 10 * D:14 * D]           # torch lin2.weight (D, 4D), contracted on dim 1

    # ---- packed bias / LayerNorm block (f32) --------------------------------
    bv_fam = aux_ref[0:1, 0 * D:1 * D]
    bo_fam = aux_ref[0:1, 1 * D:2 * D]
    bq_arm = aux_ref[0:1, 2 * D:3 * D]
    bk_arm = aux_ref[0:1, 3 * D:4 * D]
    bv_arm = aux_ref[1:2, 0 * D:1 * D]
    bo_arm = aux_ref[1:2, 1 * D:2 * D]
    b2 = aux_ref[1:2, 2 * D:3 * D]
    ln_g = aux_ref[1:2, 3 * D:4 * D]
    ln_b = aux_ref[2:3, 0 * D:1 * D]
    b1 = aux_ref[3:4, :]

    # ---- FAM, collapsed (exact): keys/values are the broadcast global row, so the
    # softmax is uniform and the attention output is query-independent.
    gf = gf_ref[...]                                                       # (Bblk, D)
    v_fam = jnp.dot(gf.astype(bf16), Wv_fam, preferred_element_type=f32) + bv_fam
    feat_rows = jnp.dot(v_fam.astype(bf16), Wo_fam,
                        preferred_element_type=f32) + bo_fam               # (Bblk, D)

    # feat = feat_rows broadcast over the N class slots; the module then forms
    # feat_start = tile(feat, N) (queries) and feat_end = repeat(feat, N) (keys).
    # Attention over the NN repeated keys == attention over the N distinct rows.
    kv_in = jnp.concatenate(
        [jnp.broadcast_to(feat_rows[b:b + 1, :], (N, D)) for b in range(Bblk)], axis=0)
    q_in = jnp.concatenate(
        [jnp.broadcast_to(feat_rows[b:b + 1, :], (NN, D)) for b in range(Bblk)], axis=0)

    # ---- ARM projections on flat (batched-M) activations --------------------
    qp = jnp.dot(q_in.astype(bf16), Wq_arm, preferred_element_type=f32) + bq_arm
    kp = jnp.dot(kv_in.astype(bf16), Wk_arm, preferred_element_type=f32) + bk_arm
    vp = jnp.dot(kv_in.astype(bf16), Wv_arm, preferred_element_type=f32) + bv_arm
    qp_b, kp_b, vp_b = qp.astype(bf16), kp.astype(bf16), vp.astype(bf16)

    # per-head scores, lane-packed -> single row-max + single exp pass
    s_heads = []
    for h in range(num_heads):
        sl = slice(h * dh, (h + 1) * dh)
        s_h = lax.dot_general(qp_b[:, sl], kp_b[:, sl], (((1,), (1,)), ((), ())),
                              preferred_element_type=f32) * scale          # (QM, KM)
        s_heads.append(s_h)
    S = jnp.concatenate(s_heads, axis=-1)                                   # (QM, H*KM)
    S = S - jnp.max(S, axis=-1, keepdims=True)   # row-wide max: valid for each group
    P = jnp.exp(S)

    if Bblk > 1:
        # 0/1 mask keeping each query row on its own batch element's keys
        # (built from splat constants, no per-step iota work).
        rows = []
        for b in range(Bblk):
            blk = [jnp.ones((NN, N), f32) if j == b else jnp.zeros((NN, N), f32)
                   for j in range(Bblk)]
            rows.append(jnp.concatenate(blk, axis=1))
        mask01 = jnp.concatenate(rows, axis=0)                              # (QM, KM)
        P = P * jnp.concatenate([mask01] * num_heads, axis=-1)

    # per-head context, accumulated straight into the O-projection
    o_acc = jnp.zeros((QM, D), f32)
    for h in range(num_heads):
        p_h = P[:, h * KM:(h + 1) * KM]                                     # (QM, KM)
        denom = jnp.sum(p_h, axis=-1, keepdims=True)
        ctx = jnp.dot(p_h.astype(bf16), vp_b[:, h * dh:(h + 1) * dh],
                      preferred_element_type=f32)                           # (QM, dh)
        ctx = ctx * pl.reciprocal(denom, approx=True)
        o_acc = o_acc + jnp.dot(ctx.astype(bf16), Wo_arm[h * dh:(h + 1) * dh, :],
                                preferred_element_type=f32)
    feat2 = o_acc + bo_arm                                                  # (QM, D)

    # ---- FFM edge projection: LayerNorm(x + lin2(relu(lin1(x)))), res=Identity ----
    h1 = jnp.dot(feat2.astype(bf16), W1, preferred_element_type=f32) + b1
    h1 = jnp.maximum(h1, 0.0)
    h2 = lax.dot_general(h1.astype(bf16), W2, (((1,), (1,)), ((), ())),
                         preferred_element_type=f32) + b2
    y = feat2 + h2
    mu = jnp.mean(y, axis=-1, keepdims=True)
    yc = y - mu
    var = jnp.mean(yc * yc, axis=-1, keepdims=True)
    y = yc * lax.rsqrt(var + eps) * ln_g + ln_b                             # (QM, D)

    # ---- lane-dense store: pack `group` D-wide edge rows per 128-lane output row --
    for b in range(Bblk):
        yb = y[b * NN:(b + 1) * NN, :]                                      # (NN, D)
        if group > 1:
            parts = [yb[g * rows_per_b:(g + 1) * rows_per_b, :] for g in range(group)]
            out_ref[b] = jnp.concatenate(parts, axis=-1)
        else:
            out_ref[b] = yb


# -----------------------------------------------------------------------------
# Wrapper: one pallas_call for the whole GEM forward
# -----------------------------------------------------------------------------

def gem_forward(params, class_feature, global_feature, num_heads=8, block_b=None):
    """class_feature: (B, N, D), global_feature: (B, 1, D) -> edge (B, N*N, D)."""
    B, N, D = class_feature.shape
    NN = N * N
    assert D % num_heads == 0
    assert global_feature.shape == (B, 1, D)

    # Fold the whole (small) batch into one grid step on single-TC chips; on v7x
    # pass block_b = B // 2 so both TensorCores get a grid step.
    if block_b is None:
        block_b = B if B <= 8 else 8
    assert B % block_b == 0
    grid = (B // block_b,)

    # lane-dense output packing factor (D=64 -> pack 2 edge rows per 128-lane row)
    if D < 128 and 128 % D == 0 and NN % (128 // D) == 0:
        group = 128 // D
    else:
        group = 1
    rows_per_b = NN // group

    fam, arm, ffm = params['fam'], params['arm'], params['ffm']
    t = jnp.transpose  # torch nn.Linear / in_proj (out, in) -> (in, out)

    # One lane-dense bf16 weight slab (D, 14D).  The FAM Q/K projections are
    # mathematically inert for this forward (uniform softmax) and are not packed.
    w_slab = jnp.concatenate([
        t(fam['in_proj_w'][2 * D:3 * D]),      # FAM Wv
        t(fam['out_w']),                       # FAM Wo
        t(arm['in_proj_w'][0 * D:1 * D]),      # ARM Wq
        t(arm['in_proj_w'][1 * D:2 * D]),      # ARM Wk
        t(arm['in_proj_w'][2 * D:3 * D]),      # ARM Wv
        t(arm['out_w']),                       # ARM Wo
        t(ffm['w1']),                          # FFM lin1 (D, 4D)
        ffm['w2'],                             # FFM lin2 weight, contracted on dim 1
    ], axis=1).astype(jnp.bfloat16)

    # Small f32 bias / LayerNorm block (8, 4D).
    z = jnp.zeros((D,), jnp.float32)
    aux = jnp.stack([
        jnp.concatenate([fam['in_proj_b'][2 * D:3 * D], fam['out_b'],
                         arm['in_proj_b'][0 * D:1 * D], arm['in_proj_b'][1 * D:2 * D]]),
        jnp.concatenate([arm['in_proj_b'][2 * D:3 * D], arm['out_b'],
                         ffm['b2'], ffm['ln_g']]),
        jnp.concatenate([ffm['ln_b'], z, z, z]),
        ffm['b1'],
    ] + [jnp.zeros((4 * D,), jnp.float32)] * 4, axis=0)

    gf2d = global_feature.reshape(B, D).astype(jnp.float32)

    flops_per_b = (4 * D * D + 2 * (NN + 2 * N) * D * D + 4 * NN * N * D
                   + 2 * NN * D * D + 16 * NN * D * D)
    cost = pl.CostEstimate(
        flops=B * flops_per_b,
        transcendentals=B * NN * (num_heads * N + num_heads + 1),
        bytes_accessed=B * D * 4 + 14 * D * D * 2 + 32 * D * 4 + B * NN * D * 4)

    kernel = partial(_gem_kernel, n_cls=N, num_heads=num_heads, group=group, eps=1e-5)

    out = pl.pallas_call(
        kernel,
        out_shape=jax.ShapeDtypeStruct((B, rows_per_b, D * group), jnp.float32),
        grid=grid,
        in_specs=[pl.BlockSpec((block_b, D), lambda i: (i, 0)),
                  pl.BlockSpec((D, 14 * D), lambda i: (0, 0)),
                  pl.BlockSpec((8, 4 * D), lambda i: (0, 0))],
        out_specs=pl.BlockSpec((block_b, rows_per_b, D * group), lambda i: (i, 0, 0)),
        compiler_params=pltpu.CompilerParams(dimension_semantics=("parallel",)),
        cost_estimate=cost,
    )(gf2d, w_slab, aux)

    # un-pack the lane-dense layout back to (B, N*N, D)  (wrapper-side layout plumbing)
    if group > 1:
        out = out.reshape(B, rows_per_b, group, D).transpose(0, 2, 1, 3)
    return out.reshape(B, NN, D)


# -----------------------------------------------------------------------------
# Faithful pure-JAX reference (full MultiheadAttention math, f32) for correctness
# -----------------------------------------------------------------------------

def gem_reference(params, class_feature, global_feature, num_heads=8):
    B, N, D = class_feature.shape
    dh = D // num_heads

    def mha(q, k, v, p):
        W, b = p['in_proj_w'], p['in_proj_b']
        qp = q @ W[:D].T + b[:D]
        kp = k @ W[D:2 * D].T + b[D:2 * D]
        vp = v @ W[2 * D:].T + b[2 * D:]

        def split(x):
            return x.reshape(x.shape[0], x.shape[1], num_heads, dh).transpose(0, 2, 1, 3)

        qh, kh, vh = split(qp), split(kp), split(vp)
        s = jnp.einsum('bhqd,bhkd->bhqk', qh, kh) / math.sqrt(dh)
        a = jax.nn.softmax(s, axis=-1)
        o = jnp.einsum('bhqk,bhkd->bhqd', a, vh)
        o = o.transpose(0, 2, 1, 3).reshape(q.shape[0], q.shape[1], D)
        return o @ p['out_w'].T + p['out_b']

    gf = jnp.broadcast_to(global_feature, (B, N, D))        # .repeat(1, N, 1).view(B, N, D)
    feat = mha(class_feature, gf, gf, params['fam'])
    feat_end = jnp.repeat(feat, N, axis=1)                  # .repeat(1, 1, N).view(B, -1, D)
    feat_start = jnp.tile(feat, (1, N, 1))                  # .repeat(1, N, 1).view(B, -1, D)
    feat2 = mha(feat_start, feat_end, feat_end, params['arm'])
    ffm = params['ffm']
    h = jax.nn.relu(feat2 @ ffm['w1'].T + ffm['b1']) @ ffm['w2'].T + ffm['b2']
    y = feat2 + h
    mu = y.mean(-1, keepdims=True)
    var = ((y - mu) ** 2).mean(-1, keepdims=True)
    return (y - mu) / jnp.sqrt(var + 1e-5) * ffm['ln_g'] + ffm['ln_b']


# -----------------------------------------------------------------------------
# Deterministic synthetic parameters (PyTorch layouts: (out, in) weights)
# -----------------------------------------------------------------------------

def init_gem_params(key, d, expansion=4):
    ks = jax.random.split(key, 12)

    def mk(k, shape, std=0.05):
        return jax.random.normal(k, shape, jnp.float32) * std

    def mha_p(k1, k2, k3, k4):
        return dict(in_proj_w=mk(k1, (3 * d, d)), in_proj_b=mk(k2, (3 * d,), 0.01),
                    out_w=mk(k3, (d, d)), out_b=mk(k4, (d,), 0.01))

    fam = mha_p(*ks[0:4])
    arm = mha_p(*ks[4:8])
    ffm = dict(w1=mk(ks[8], (expansion * d, d)), b1=mk(ks[9], (expansion * d,), 0.01),
               w2=mk(ks[10], (d, expansion * d)), b2=mk(ks[11], (d,), 0.01),
               ln_g=jnp.ones((d,), jnp.float32), ln_b=jnp.zeros((d,), jnp.float32))
    return dict(fam=fam, arm=arm, ffm=ffm)


# -----------------------------------------------------------------------------
# Main
# -----------------------------------------------------------------------------

if __name__ == "__main__":
    B, NUM_CLASSES, IN_DIM, NUM_HEADS = 2, 4, 64, 8

    key = jax.random.PRNGKey(0)
    k_p, k_c, k_g = jax.random.split(key, 3)
    params = init_gem_params(k_p, IN_DIM)
    class_feature = jax.random.normal(k_c, (B, NUM_CLASSES, IN_DIM), jnp.float32)
    global_feature = jax.random.normal(k_g, (B, 1, IN_DIM), jnp.float32)

    fwd = jax.jit(partial(gem_forward, num_heads=NUM_HEADS))
    edge = fwd(params, class_feature, global_feature)
    jax.block_until_ready(edge)

    assert edge.shape == (B, NUM_CLASSES * NUM_CLASSES, IN_DIM)
    assert bool(jnp.all(jnp.isfinite(edge)))

    # Structural correctness vs the faithful f32 reference (tolerance covers the
    # deliberate bf16 weight / MXU-input quantisation in the kernel).
    ref = gem_reference(params, class_feature, global_feature, NUM_HEADS)
    err = float(jnp.max(jnp.abs(edge - ref)))
    assert err < 1e-1, f"max abs error vs reference: {err}"

    print("KERNEL_OK")
</pallas_src>

<mosaic_0001>
module attributes {stable_mosaic.version = 11 : i64} {
  func.func @_gem_kernel(%arg0: i32, %arg1: memref<2x64xf32, #tpu.memory_space<vmem>>, %arg2: memref<64x896xbf16, #tpu.memory_space<vmem>>, %arg3: memref<8x256xf32, #tpu.memory_space<vmem>>, %arg4: memref<2x8x128xf32, #tpu.memory_space<vmem>>) attributes {dimension_semantics = [#tpu.dimension_semantics<parallel>], iteration_bounds = array<i64: 1>, scalar_prefetch = 0 : i64, scratch_operands = 0 : i64, tpu.core_type = #tpu.core_type<tc>, window_params = [{transform_indices = @transform_0, window_bounds = array<i64: 2, 64>}, {pipeline_mode = #tpu.pipeline_mode<synchronous>, transform_indices = @transform_1, window_bounds = array<i64: 64, 896>}, {pipeline_mode = #tpu.pipeline_mode<synchronous>, transform_indices = @transform_2, window_bounds = array<i64: 8, 256>}, {transform_indices = @transform_3, window_bounds = array<i64: 2, 8, 128>}]} {
    %c0 = arith.constant 0 : index
    %c0_0 = arith.constant 0 : index
    %0 = vector.load %arg2[%c0, %c0_0] : memref<64x896xbf16, #tpu.memory_space<vmem>>, vector<64x64xbf16>
    %c0_1 = arith.constant 0 : index
    %c64 = arith.constant 64 : index
    %1 = vector.load %arg2[%c0_1, %c64] : memref<64x896xbf16, #tpu.memory_space<vmem>>, vector<64x64xbf16>
    %c0_2 = arith.constant 0 : index
    %c128 = arith.constant 128 : index
    %2 = vector.load %arg2[%c0_2, %c128] : memref<64x896xbf16, #tpu.memory_space<vmem>>, vector<64x64xbf16>
    %c0_3 = arith.constant 0 : index
    %c192 = arith.constant 192 : index
    %3 = vector.load %arg2[%c0_3, %c192] : memref<64x896xbf16, #tpu.memory_space<vmem>>, vector<64x64xbf16>
    %c0_4 = arith.constant 0 : index
    %c256 = arith.constant 256 : index
    %4 = vector.load %arg2[%c0_4, %c256] : memref<64x896xbf16, #tpu.memory_space<vmem>>, vector<64x64xbf16>
    %c0_5 = arith.constant 0 : index
    %c320 = arith.constant 320 : index
    %5 = vector.load %arg2[%c0_5, %c320] : memref<64x896xbf16, #tpu.memory_space<vmem>>, vector<64x64xbf16>
    %c0_6 = arith.constant 0 : index
    %c384 = arith.constant 384 : index
    %6 = vector.load %arg2[%c0_6, %c384] : memref<64x896xbf16, #tpu.memory_space<vmem>>, vector<64x256xbf16>
    %c0_7 = arith.constant 0 : index
    %c640 = arith.constant 640 : index
    %7 = vector.load %arg2[%c0_7, %c640] : memref<64x896xbf16, #tpu.memory_space<vmem>>, vector<64x256xbf16>
    %c0_8 = arith.constant 0 : index
    %c0_9 = arith.constant 0 : index
    %8 = vector.load %arg3[%c0_8, %c0_9] : memref<8x256xf32, #tpu.memory_space<vmem>>, vector<1x64xf32>
    %c0_10 = arith.constant 0 : index
    %c64_11 = arith.constant 64 : index
    %9 = vector.load %arg3[%c0_10, %c64_11] : memref<8x256xf32, #tpu.memory_space<vmem>>, vector<1x64xf32>
    %c0_12 = arith.constant 0 : index
    %c128_13 = arith.constant 128 : index
    %10 = vector.load %arg3[%c0_12, %c128_13] : memref<8x256xf32, #tpu.memory_space<vmem>>, vector<1x64xf32>
    %c0_14 = arith.constant 0 : index
    %c192_15 = arith.constant 192 : index
    %11 = vector.load %arg3[%c0_14, %c192_15] : memref<8x256xf32, #tpu.memory_space<vmem>>, vector<1x64xf32>
    %c1 = arith.constant 1 : index
    %c0_16 = arith.constant 0 : index
    %12 = vector.load %arg3[%c1, %c0_16] : memref<8x256xf32, #tpu.memory_space<vmem>>, vector<1x64xf32>
    %c1_17 = arith.constant 1 : index
    %c64_18 = arith.constant 64 : index
    %13 = vector.load %arg3[%c1_17, %c64_18] : memref<8x256xf32, #tpu.memory_space<vmem>>, vector<1x64xf32>
    %c1_19 = arith.constant 1 : index
    %c128_20 = arith.constant 128 : index
    %14 = vector.load %arg3[%c1_19, %c128_20] : memref<8x256xf32, #tpu.memory_space<vmem>>, vector<1x64xf32>
    %c1_21 = arith.constant 1 : index
    %c192_22 = arith.constant 192 : index
    %15 = vector.load %arg3[%c1_21, %c192_22] : memref<8x256xf32, #tpu.memory_space<vmem>>, vector<1x64xf32>
    %c2 = arith.constant 2 : index
    %c0_23 = arith.constant 0 : index
    %16 = vector.load %arg3[%c2, %c0_23] : memref<8x256xf32, #tpu.memory_space<vmem>>, vector<1x64xf32>
    %c3 = arith.constant 3 : index
    %c0_24 = arith.constant 0 : index
    %17 = vector.load %arg3[%c3, %c0_24] : memref<8x256xf32, #tpu.memory_space<vmem>>, vector<1x256xf32>
    %c0_25 = arith.constant 0 : index
    %c0_26 = arith.constant 0 : index
    %18 = vector.load %arg1[%c0_25, %c0_26] : memref<2x64xf32, #tpu.memory_space<vmem>>, vector<2x64xf32>
    %19 = arith.truncf %18 : vector<2x64xf32> to vector<2x64xbf16>
    %cst = arith.constant dense<0.000000e+00> : vector<2x64xf32>
    %20 = tpu.matmul %19, %0, %cst {dimension_numbers = #tpu.dot_dimension_numbers<[1], [0], [0], [1], [0, 0, 1, 1], [], []>} : vector<2x64xbf16>, vector<64x64xbf16>, vector<2x64xf32> -> vector<2x64xf32>
    %21 = vector.broadcast %8 : vector<1x64xf32> to vector<2x64xf32>
    %22 = arith.addf %20, %21 : vector<2x64xf32>
    %23 = arith.truncf %22 : vector<2x64xf32> to vector<2x64xbf16>
    %cst_27 = arith.constant dense<0.000000e+00> : vector<2x64xf32>
    %24 = tpu.matmul %23, %1, %cst_27 {dimension_numbers = #tpu.dot_dimension_numbers<[1], [0], [0], [1], [0, 0, 1, 1], [], []>} : vector<2x64xbf16>, vector<64x64xbf16>, vector<2x64xf32> -> vector<2x64xf32>
    %25 = vector.broadcast %9 : vector<1x64xf32> to vector<2x64xf32>
    %26 = arith.addf %24, %25 : vector<2x64xf32>
    %27 = vector.extract_strided_slice %26 {offsets = [0, 0], sizes = [1, 64], strides = [1, 1]} : vector<2x64xf32> to vector<1x64xf32>
    %28 = vector.shape_cast %27 : vector<1x64xf32> to vector<1x64xf32>
    %29 = vector.broadcast %28 : vector<1x64xf32> to vector<4x64xf32>
    %30 = vector.extract_strided_slice %26 {offsets = [1, 0], sizes = [1, 64], strides = [1, 1]} : vector<2x64xf32> to vector<1x64xf32>
    %31 = vector.shape_cast %30 : vector<1x64xf32> to vector<1x64xf32>
    %32 = vector.broadcast %31 : vector<1x64xf32> to vector<4x64xf32>
    %33 = tpu.concatenate %29, %32 in 0 : vector<4x64xf32>, vector<4x64xf32> -> vector<8x64xf32>
    %34 = vector.extract_strided_slice %26 {offsets = [0, 0], sizes = [1, 64], strides = [1, 1]} : vector<2x64xf32> to vector<1x64xf32>
    %35 = vector.shape_cast %34 : vector<1x64xf32> to vector<1x64xf32>
    %36 = vector.broadcast %35 : vector<1x64xf32> to vector<16x64xf32>
    %37 = vector.extract_strided_slice %26 {offsets = [1, 0], sizes = [1, 64], strides = [1, 1]} : vector<2x64xf32> to vector<1x64xf32>
    %38 = vector.shape_cast %37 : vector<1x64xf32> to vector<1x64xf32>
    %39 = vector.broadcast %38 : vector<1x64xf32> to vector<16x64xf32>
    %40 = tpu.concatenate %36, %39 in 0 : vector<16x64xf32>, vector<16x64xf32> -> vector<32x64xf32>
    %41 = arith.truncf %40 : vector<32x64xf32> to vector<32x64xbf16>
    %cst_28 = arith.constant dense<0.000000e+00> : vector<32x64xf32>
    %42 = tpu.matmul %41, %2, %cst_28 {dimension_numbers = #tpu.dot_dimension_numbers<[1], [0], [0], [1], [0, 0, 1, 1], [], []>} : vector<32x64xbf16>, vector<64x64xbf16>, vector<32x64xf32> -> vector<32x64xf32>
    %43 = vector.broadcast %10 : vector<1x64xf32> to vector<32x64xf32>
    %44 = arith.addf %42, %43 : vector<32x64xf32>
    %45 = arith.truncf %33 : vector<8x64xf32> to vector<8x64xbf16>
    %cst_29 = arith.constant dense<0.000000e+00> : vector<8x64xf32>
    %46 = tpu.matmul %45, %3, %cst_29 {dimension_numbers = #tpu.dot_dimension_numbers<[1], [0], [0], [1], [0, 0, 1, 1], [], []>} : vector<8x64xbf16>, vector<64x64xbf16>, vector<8x64xf32> -> vector<8x64xf32>
    %47 = vector.broadcast %11 : vector<1x64xf32> to vector<8x64xf32>
    %48 = arith.addf %46, %47 : vector<8x64xf32>
    %49 = arith.truncf %33 : vector<8x64xf32> to vector<8x64xbf16>
    %cst_30 = arith.constant dense<0.000000e+00> : vector<8x64xf32>
    %50 = tpu.matmul %49, %4, %cst_30 {dimension_numbers = #tpu.dot_dimension_numbers<[1], [0], [0], [1], [0, 0, 1, 1], [], []>} : vector<8x64xbf16>, vector<64x64xbf16>, vector<8x64xf32> -> vector<8x64xf32>
    %51 = vector.broadcast %12 : vector<1x64xf32> to vector<8x64xf32>
    %52 = arith.addf %50, %51 : vector<8x64xf32>
    %53 = arith.truncf %44 : vector<32x64xf32> to vector<32x64xbf16>
    %54 = arith.truncf %48 : vector<8x64xf32> to vector<8x64xbf16>
    %55 = arith.truncf %52 : vector<8x64xf32> to vector<8x64xbf16>
    %56 = vector.extract_strided_slice %53 {offsets = [0, 0], sizes = [32, 8], strides = [1, 1]} : vector<32x64xbf16> to vector<32x8xbf16>
    %57 = vector.extract_strided_slice %54 {offsets = [0, 0], sizes = [8, 8], strides = [1, 1]} : vector<8x64xbf16> to vector<8x8xbf16>
    %cst_31 = arith.constant dense<0.000000e+00> : vector<32x8xf32>
    %58 = tpu.matmul %56, %57, %cst_31 {dimension_numbers = #tpu.dot_dimension_numbers<[1], [1], [0], [0], [0, 0, 1, 0], [], []>} : vector<32x8xbf16>, vector<8x8xbf16>, vector<32x8xf32> -> vector<32x8xf32>
    %cst_32 = arith.constant 0.353553385 : f32
    %59 = vector.broadcast %cst_32 : f32 to vector<32x8xf32>
    %60 = arith.mulf %58, %59 : vector<32x8xf32>
    %61 = vector.extract_strided_slice %53 {offsets = [0, 8], sizes = [32, 8], strides = [1, 1]} : vector<32x64xbf16> to vector<32x8xbf16>
    %62 = vector.extract_strided_slice %54 {offsets = [0, 8], sizes = [8, 8], strides = [1, 1]} : vector<8x64xbf16> to vector<8x8xbf16>
    %cst_33 = arith.constant dense<0.000000e+00> : vector<32x8xf32>
    %63 = tpu.matmul %61, %62, %cst_33 {dimension_numbers = #tpu.dot_dimension_numbers<[1], [1], [0], [0], [0, 0, 1, 0], [], []>} : vector<32x8xbf16>, vector<8x8xbf16>, vector<32x8xf32> -> vector<32x8xf32>
    %cst_34 = arith.constant 0.353553385 : f32
    %64 = vector.broadcast %cst_34 : f32 to vector<32x8xf32>
    %65 = arith.mulf %63, %64 : vector<32x8xf32>
    %66 = vector.extract_strided_slice %53 {offsets = [0, 16], sizes = [32, 8], strides = [1, 1]} : vector<32x64xbf16> to vector<32x8xbf16>
    %67 = vector.extract_strided_slice %54 {offsets = [0, 16], sizes = [8, 8], strides = [1, 1]} : vector<8x64xbf16> to vector<8x8xbf16>
    %cst_35 = arith.constant dense<0.000000e+00> : vector<32x8xf32>
    %68 = tpu.matmul %66, %67, %cst_35 {dimension_numbers = #tpu.dot_dimension_numbers<[1], [1], [0], [0], [0, 0, 1, 0], [], []>} : vector<32x8xbf16>, vector<8x8xbf16>, vector<32x8xf32> -> vector<32x8xf32>
    %cst_36 = arith.constant 0.353553385 : f32
    %69 = vector.broadcast %cst_36 : f32 to vector<32x8xf32>
    %70 = arith.mulf %68, %69 : vector<32x8xf32>
    %71 = vector.extract_strided_slice %53 {offsets = [0, 24], sizes = [32, 8], strides = [1, 1]} : vector<32x64xbf16> to vector<32x8xbf16>
    %72 = vector.extract_strided_slice %54 {offsets = [0, 24], sizes = [8, 8], strides = [1, 1]} : vector<8x64xbf16> to vector<8x8xbf16>
    %cst_37 = arith.constant dense<0.000000e+00> : vector<32x8xf32>
    %73 = tpu.matmul %71, %72, %cst_37 {dimension_numbers = #tpu.dot_dimension_numbers<[1], [1], [0], [0], [0, 0, 1, 0], [], []>} : vector<32x8xbf16>, vector<8x8xbf16>, vector<32x8xf32> -> vector<32x8xf32>
    %cst_38 = arith.constant 0.353553385 : f32
    %74 = vector.broadcast %cst_38 : f32 to vector<32x8xf32>
    %75 = arith.mulf %73, %74 : vector<32x8xf32>
    %76 = vector.extract_strided_slice %53 {offsets = [0, 32], sizes = [32, 8], strides = [1, 1]} : vector<32x64xbf16> to vector<32x8xbf16>
    %77 = vector.extract_strided_slice %54 {offsets = [0, 32], sizes = [8, 8], strides = [1, 1]} : vector<8x64xbf16> to vector<8x8xbf16>
    %cst_39 = arith.constant dense<0.000000e+00> : vector<32x8xf32>
    %78 = tpu.matmul %76, %77, %cst_39 {dimension_numbers = #tpu.dot_dimension_numbers<[1], [1], [0], [0], [0, 0, 1, 0], [], []>} : vector<32x8xbf16>, vector<8x8xbf16>, vector<32x8xf32> -> vector<32x8xf32>
    %cst_40 = arith.constant 0.353553385 : f32
    %79 = vector.broadcast %cst_40 : f32 to vector<32x8xf32>
    %80 = arith.mulf %78, %79 : vector<32x8xf32>
    %81 = vector.extract_strided_slice %53 {offsets = [0, 40], sizes = [32, 8], strides = [1, 1]} : vector<32x64xbf16> to vector<32x8xbf16>
    %82 = vector.extract_strided_slice %54 {offsets = [0, 40], sizes = [8, 8], strides = [1, 1]} : vector<8x64xbf16> to vector<8x8xbf16>
    %cst_41 = arith.constant dense<0.000000e+00> : vector<32x8xf32>
    %83 = tpu.matmul %81, %82, %cst_41 {dimension_numbers = #tpu.dot_dimension_numbers<[1], [1], [0], [0], [0, 0, 1, 0], [], []>} : vector<32x8xbf16>, vector<8x8xbf16>, vector<32x8xf32> -> vector<32x8xf32>
    %cst_42 = arith.constant 0.353553385 : f32
    %84 = vector.broadcast %cst_42 : f32 to vector<32x8xf32>
    %85 = arith.mulf %83, %84 : vector<32x8xf32>
    %86 = vector.extract_strided_slice %53 {offsets = [0, 48], sizes = [32, 8], strides = [1, 1]} : vector<32x64xbf16> to vector<32x8xbf16>
    %87 = vector.extract_strided_slice %54 {offsets = [0, 48], sizes = [8, 8], strides = [1, 1]} : vector<8x64xbf16> to vector<8x8xbf16>
    %cst_43 = arith.constant dense<0.000000e+00> : vector<32x8xf32>
    %88 = tpu.matmul %86, %87, %cst_43 {dimension_numbers = #tpu.dot_dimension_numbers<[1], [1], [0], [0], [0, 0, 1, 0], [], []>} : vector<32x8xbf16>, vector<8x8xbf16>, vector<32x8xf32> -> vector<32x8xf32>
    %cst_44 = arith.constant 0.353553385 : f32
    %89 = vector.broadcast %cst_44 : f32 to vector<32x8xf32>
    %90 = arith.mulf %88, %89 : vector<32x8xf32>
    %91 = vector.extract_strided_slice %53 {offsets = [0, 56], sizes = [32, 8], strides = [1, 1]} : vector<32x64xbf16> to vector<32x8xbf16>
    %92 = vector.extract_strided_slice %54 {offsets = [0, 56], sizes = [8, 8], strides = [1, 1]} : vector<8x64xbf16> to vector<8x8xbf16>
    %cst_45 = arith.constant dense<0.000000e+00> : vector<32x8xf32>
    %93 = tpu.matmul %91, %92, %cst_45 {dimension_numbers = #tpu.dot_dimension_numbers<[1], [1], [0], [0], [0, 0, 1, 0], [], []>} : vector<32x8xbf16>, vector<8x8xbf16>, vector<32x8xf32> -> vector<32x8xf32>
    %cst_46 = arith.constant 0.353553385 : f32
    %94 = vector.broadcast %cst_46 : f32 to vector<32x8xf32>
    %95 = arith.mulf %93, %94 : vector<32x8xf32>
    %96 = tpu.concatenate %60, %65, %70, %75, %80, %85, %90, %95 in 1 : vector<32x8xf32>, vector<32x8xf32>, vector<32x8xf32>, vector<32x8xf32>, vector<32x8xf32>, vector<32x8xf32>, vector<32x8xf32>, vector<32x8xf32> -> vector<32x64xf32>
    %cst_47 = arith.constant dense<0xFF800000> : vector<32xf32>
    %97 = vector.multi_reduction <maximumf>, %96, %cst_47 [1] : vector<32x64xf32> to vector<32xf32>
    %98 = vector.shape_cast %97 : vector<32xf32> to vector<32x1xf32>
    %99 = vector.broadcast %98 : vector<32x1xf32> to vector<32x64xf32>
    %100 = arith.subf %96, %99 : vector<32x64xf32>
    %101 = math.exp %100 : vector<32x64xf32>
    %cst_48 = arith.constant 1.000000e+00 : f32
    %102 = vector.broadcast %cst_48 : f32 to vector<16x4xf32>
    %cst_49 = arith.constant 0.000000e+00 : f32
    %103 = vector.broadcast %cst_49 : f32 to vector<16x4xf32>
    %104 = tpu.concatenate %102, %103 in 1 : vector<16x4xf32>, vector<16x4xf32> -> vector<16x8xf32>
    %cst_50 = arith.constant 0.000000e+00 : f32
    %105 = vector.broadcast %cst_50 : f32 to vector<16x4xf32>
    %cst_51 = arith.constant 1.000000e+00 : f32
    %106 = vector.broadcast %cst_51 : f32 to vector<16x4xf32>
    %107 = tpu.concatenate %105, %106 in 1 : vector<16x4xf32>, vector<16x4xf32> -> vector<16x8xf32>
    %108 = tpu.concatenate %104, %107 in 0 : vector<16x8xf32>, vector<16x8xf32> -> vector<32x8xf32>
    %109 = tpu.concatenate %108, %108, %108, %108, %108, %108, %108, %108 in 1 : vector<32x8xf32>, vector<32x8xf32>, vector<32x8xf32>, vector<32x8xf32>, vector<32x8xf32>, vector<32x8xf32>, vector<32x8xf32>, vector<32x8xf32> -> vector<32x64xf32>
    %110 = arith.mulf %101, %109 : vector<32x64xf32>
    %cst_52 = arith.constant 0.000000e+00 : f32
    %111 = vector.broadcast %cst_52 : f32 to vector<32x64xf32>
    %112 = vector.extract_strided_slice %110 {offsets = [0, 0], sizes = [32, 8], strides = [1, 1]} : vector<32x64xf32> to vector<32x8xf32>
    %cst_53 = arith.constant dense<0.000000e+00> : vector<32xf32>
    %113 = vector.multi_reduction <add>, %112, %cst_53 [1] : vector<32x8xf32> to vector<32xf32>
    %114 = vector.shape_cast %113 : vector<32xf32> to vector<32x1xf32>
    %115 = arith.truncf %112 : vector<32x8xf32> to vector<32x8xbf16>
    %116 = vector.extract_strided_slice %55 {offsets = [0, 0], sizes = [8, 8], strides = [1, 1]} : vector<8x64xbf16> to vector<8x8xbf16>
    %cst_54 = arith.constant dense<0.000000e+00> : vector<32x8xf32>
    %117 = tpu.matmul %115, %116, %cst_54 {dimension_numbers = #tpu.dot_dimension_numbers<[1], [0], [0], [1], [0, 0, 1, 1], [], []>} : vector<32x8xbf16>, vector<8x8xbf16>, vector<32x8xf32> -> vector<32x8xf32>
    %118 = tpu.reciprocal %114 {approx = true} : vector<32x1xf32> -> vector<32x1xf32>
    %119 = vector.broadcast %118 : vector<32x1xf32> to vector<32x8xf32>
    %120 = arith.mulf %117, %119 : vector<32x8xf32>
    %121 = arith.truncf %120 : vector<32x8xf32> to vector<32x8xbf16>
    %122 = vector.extract_strided_slice %5 {offsets = [0, 0], sizes = [8, 64], strides = [1, 1]} : vector<64x64xbf16> to vector<8x64xbf16>
    %cst_55 = arith.constant dense<0.000000e+00> : vector<32x64xf32>
    %123 = tpu.matmul %121, %122, %cst_55 {dimension_numbers = #tpu.dot_dimension_numbers<[1], [0], [0], [1], [0, 0, 1, 1], [], []>} : vector<32x8xbf16>, vector<8x64xbf16>, vector<32x64xf32> -> vector<32x64xf32>
    %124 = arith.addf %111, %123 : vector<32x64xf32>
    %125 = vector.extract_strided_slice %110 {offsets = [0, 8], sizes = [32, 8], strides = [1, 1]} : vector<32x64xf32> to vector<32x8xf32>
    %cst_56 = arith.constant dense<0.000000e+00> : vector<32xf32>
    %126 = vector.multi_reduction <add>, %125, %cst_56 [1] : vector<32x8xf32> to vector<32xf32>
    %127 = vector.shape_cast %126 : vector<32xf32> to vector<32x1xf32>
    %128 = arith.truncf %125 : vector<32x8xf32> to vector<32x8xbf16>
    %129 = vector.extract_strided_slice %55 {offsets = [0, 8], sizes = [8, 8], strides = [1, 1]} : vector<8x64xbf16> to vector<8x8xbf16>
    %cst_57 = arith.constant dense<0.000000e+00> : vector<32x8xf32>
    %130 = tpu.matmul %128, %129, %cst_57 {dimension_numbers = #tpu.dot_dimension_numbers<[1], [0], [0], [1], [0, 0, 1, 1], [], []>} : vector<32x8xbf16>, vector<8x8xbf16>, vector<32x8xf32> -> vector<32x8xf32>
    %131 = tpu.reciprocal %127 {approx = true} : vector<32x1xf32> -> vector<32x1xf32>
    %132 = vector.broadcast %131 : vector<32x1xf32> to vector<32x8xf32>
    %133 = arith.mulf %130, %132 : vector<32x8xf32>
    %134 = arith.truncf %133 : vector<32x8xf32> to vector<32x8xbf16>
    %135 = vector.extract_strided_slice %5 {offsets = [8, 0], sizes = [8, 64], strides = [1, 1]} : vector<64x64xbf16> to vector<8x64xbf16>
    %cst_58 = arith.constant dense<0.000000e+00> : vector<32x64xf32>
    %136 = tpu.matmul %134, %135, %cst_58 {dimension_numbers = #tpu.dot_dimension_numbers<[1], [0], [0], [1], [0, 0, 1, 1], [], []>} : vector<32x8xbf16>, vector<8x64xbf16>, vector<32x64xf32> -> vector<32x64xf32>
    %137 = arith.addf %124, %136 : vector<32x64xf32>
    %138 = vector.extract_strided_slice %110 {offsets = [0, 16], sizes = [32, 8], strides = [1, 1]} : vector<32x64xf32> to vector<32x8xf32>
    %cst_59 = arith.constant dense<0.000000e+00> : vector<32xf32>
    %139 = vector.multi_reduction <add>, %138, %cst_59 [1] : vector<32x8xf32> to vector<32xf32>
    %140 = vector.shape_cast %139 : vector<32xf32> to vector<32x1xf32>
    %141 = arith.truncf %138 : vector<32x8xf32> to vector<32x8xbf16>
    %142 = vector.extract_strided_slice %55 {offsets = [0, 16], sizes = [8, 8], strides = [1, 1]} : vector<8x64xbf16> to vector<8x8xbf16>
    %cst_60 = arith.constant dense<0.000000e+00> : vector<32x8xf32>
    %143 = tpu.matmul %141, %142, %cst_60 {dimension_numbers = #tpu.dot_dimension_numbers<[1], [0], [0], [1], [0, 0, 1, 1], [], []>} : vector<32x8xbf16>, vector<8x8xbf16>, vector<32x8xf32> -> vector<32x8xf32>
    %144 = tpu.reciprocal %140 {approx = true} : vector<32x1xf32> -> vector<32x1xf32>
    %145 = vector.broadcast %144 : vector<32x1xf32> to vector<32x8xf32>
    %146 = arith.mulf %143, %145 : vector<32x8xf32>
    %147 = arith.truncf %146 : vector<32x8xf32> to vector<32x8xbf16>
    %148 = vector.extract_strided_slice %5 {offsets = [16, 0], sizes = [8, 64], strides = [1, 1]} : vector<64x64xbf16> to vector<8x64xbf16>
    %cst_61 = arith.constant dense<0.000000e+00> : vector<32x64xf32>
    %149 = tpu.matmul %147, %148, %cst_61 {dimension_numbers = #tpu.dot_dimension_numbers<[1], [0], [0], [1], [0, 0, 1, 1], [], []>} : vector<32x8xbf16>, vector<8x64xbf16>, vector<32x64xf32> -> vector<32x64xf32>
    %150 = arith.addf %137, %149 : vector<32x64xf32>
    %151 = vector.extract_strided_slice %110 {offsets = [0, 24], sizes = [32, 8], strides = [1, 1]} : vector<32x64xf32> to vector<32x8xf32>
    %cst_62 = arith.constant dense<0.000000e+00> : vector<32xf32>
    %152 = vector.multi_reduction <add>, %151, %cst_62 [1] : vector<32x8xf32> to vector<32xf32>
    %153 = vector.shape_cast %152 : vector<32xf32> to vector<32x1xf32>
    %154 = arith.truncf %151 : vector<32x8xf32> to vector<32x8xbf16>
    %155 = vector.extract_strided_slice %55 {offsets = [0, 24], sizes = [8, 8], strides = [1, 1]} : vector<8x64xbf16> to vector<8x8xbf16>
    %cst_63 = arith.constant dense<0.000000e+00> : vector<32x8xf32>
    %156 = tpu.matmul %154, %155, %cst_63 {dimension_numbers = #tpu.dot_dimension_numbers<[1], [0], [0], [1], [0, 0, 1, 1], [], []>} : vector<32x8xbf16>, vector<8x8xbf16>, vector<32x8xf32> -> vector<32x8xf32>
    %157 = tpu.reciprocal %153 {approx = true} : vector<32x1xf32> -> vector<32x1xf32>
    %158 = vector.broadcast %157 : vector<32x1xf32> to vector<32x8xf32>
    %159 = arith.mulf %156, %158 : vector<32x8xf32>
    %160 = arith.truncf %159 : vector<32x8xf32> to vector<32x8xbf16>
    %161 = vector.extract_strided_slice %5 {offsets = [24, 0], sizes = [8, 64], strides = [1, 1]} : vector<64x64xbf16> to vector<8x64xbf16>
    %cst_64 = arith.constant dense<0.000000e+00> : vector<32x64xf32>
    %162 = tpu.matmul %160, %161, %cst_64 {dimension_numbers = #tpu.dot_dimension_numbers<[1], [0], [0], [1], [0, 0, 1, 1], [], []>} : vector<32x8xbf16>, vector<8x64xbf16>, vector<32x64xf32> -> vector<32x64xf32>
    %163 = arith.addf %150, %162 : vector<32x64xf32>
    %164 = vector.extract_strided_slice %110 {offsets = [0, 32], sizes = [32, 8], strides = [1, 1]} : vector<32x64xf32> to vector<32x8xf32>
    %cst_65 = arith.constant dense<0.000000e+00> : vector<32xf32>
    %165 = vector.multi_reduction <add>, %164, %cst_65 [1] : vector<32x8xf32> to vector<32xf32>
    %166 = vector.shape_cast %165 : vector<32xf32> to vector<32x1xf32>
    %167 = arith.truncf %164 : vector<32x8xf32> to vector<32x8xbf16>
    %168 = vector.extract_strided_slice %55 {offsets = [0, 32], sizes = [8, 8], strides = [1, 1]} : vector<8x64xbf16> to vector<8x8xbf16>
    %cst_66 = arith.constant dense<0.000000e+00> : vector<32x8xf32>
    %169 = tpu.matmul %167, %168, %cst_66 {dimension_numbers = #tpu.dot_dimension_numbers<[1], [0], [0], [1], [0, 0, 1, 1], [], []>} : vector<32x8xbf16>, vector<8x8xbf16>, vector<32x8xf32> -> vector<32x8xf32>
    %170 = tpu.reciprocal %166 {approx = true} : vector<32x1xf32> -> vector<32x1xf32>
    %171 = vector.broadcast %170 : vector<32x1xf32> to vector<32x8xf32>
    %172 = arith.mulf %169, %171 : vector<32x8xf32>
    %173 = arith.truncf %172 : vector<32x8xf32> to vector<32x8xbf16>
    %174 = vector.extract_strided_slice %5 {offsets = [32, 0], sizes = [8, 64], strides = [1, 1]} : vector<64x64xbf16> to vector<8x64xbf16>
    %cst_67 = arith.constant dense<0.000000e+00> : vector<32x64xf32>
    %175 = tpu.matmul %173, %174, %cst_67 {dimension_numbers = #tpu.dot_dimension_numbers<[1], [0], [0], [1], [0, 0, 1, 1], [], []>} : vector<32x8xbf16>, vector<8x64xbf16>, vector<32x64xf32> -> vector<32x64xf32>
    %176 = arith.addf %163, %175 : vector<32x64xf32>
    %177 = vector.extract_strided_slice %110 {offsets = [0, 40], sizes = [32, 8], strides = [1, 1]} : vector<32x64xf32> to vector<32x8xf32>
    %cst_68 = arith.constant dense<0.000000e+00> : vector<32xf32>
    %178 = vector.multi_reduction <add>, %177, %cst_68 [1] : vector<32x8xf32> to vector<32xf32>
    %179 = vector.shape_cast %178 : vector<32xf32> to vector<32x1xf32>
    %180 = arith.truncf %177 : vector<32x8xf32> to vector<32x8xbf16>
    %181 = vector.extract_strided_slice %55 {offsets = [0, 40], sizes = [8, 8], strides = [1, 1]} : vector<8x64xbf16> to vector<8x8xbf16>
    %cst_69 = arith.constant dense<0.000000e+00> : vector<32x8xf32>
    %182 = tpu.matmul %180, %181, %cst_69 {dimension_numbers = #tpu.dot_dimension_numbers<[1], [0], [0], [1], [0, 0, 1, 1], [], []>} : vector<32x8xbf16>, vector<8x8xbf16>, vector<32x8xf32> -> vector<32x8xf32>
    %183 = tpu.reciprocal %179 {approx = true} : vector<32x1xf32> -> vector<32x1xf32>
    %184 = vector.broadcast %183 : vector<32x1xf32> to vector<32x8xf32>
    %185 = arith.mulf %182, %184 : vector<32x8xf32>
    %186 = arith.truncf %185 : vector<32x8xf32> to vector<32x8xbf16>
    %187 = vector.extract_strided_slice %5 {offsets = [40, 0], sizes = [8, 64], strides = [1, 1]} : vector<64x64xbf16> to vector<8x64xbf16>
    %cst_70 = arith.constant dense<0.000000e+00> : vector<32x64xf32>
    %188 = tpu.matmul %186, %187, %cst_70 {dimension_numbers = #tpu.dot_dimension_numbers<[1], [0], [0], [1], [0, 0, 1, 1], [], []>} : vector<32x8xbf16>, vector<8x64xbf16>, vector<32x64xf32> -> vector<32x64xf32>
    %189 = arith.addf %176, %188 : vector<32x64xf32>
    %190 = vector.extract_strided_slice %110 {offsets = [0, 48], sizes = [32, 8], strides = [1, 1]} : vector<32x64xf32> to vector<32x8xf32>
    %cst_71 = arith.constant dense<0.000000e+00> : vector<32xf32>
    %191 = vector.multi_reduction <add>, %190, %cst_71 [1] : vector<32x8xf32> to vector<32xf32>
    %192 = vector.shape_cast %191 : vector<32xf32> to vector<32x1xf32>
    %193 = arith.truncf %190 : vector<32x8xf32> to vector<32x8xbf16>
    %194 = vector.extract_strided_slice %55 {offsets = [0, 48], sizes = [8, 8], strides = [1, 1]} : vector<8x64xbf16> to vector<8x8xbf16>
    %cst_72 = arith.constant dense<0.000000e+00> : vector<32x8xf32>
    %195 = tpu.matmul %193, %194, %cst_72 {dimension_numbers = #tpu.dot_dimension_numbers<[1], [0], [0], [1], [0, 0, 1, 1], [], []>} : vector<32x8xbf16>, vector<8x8xbf16>, vector<32x8xf32> -> vector<32x8xf32>
    %196 = tpu.reciprocal %192 {approx = true} : vector<32x1xf32> -> vector<32x1xf32>
    %197 = vector.broadcast %196 : vector<32x1xf32> to vector<32x8xf32>
    %198 = arith.mulf %195, %197 : vector<32x8xf32>
    %199 = arith.truncf %198 : vector<32x8xf32> to vector<32x8xbf16>
    %200 = vector.extract_strided_slice %5 {offsets = [48, 0], sizes = [8, 64], strides = [1, 1]} : vector<64x64xbf16> to vector<8x64xbf16>
    %cst_73 = arith.constant dense<0.000000e+00> : vector<32x64xf32>
    %201 = tpu.matmul %199, %200, %cst_73 {dimension_numbers = #tpu.dot_dimension_numbers<[1], [0], [0], [1], [0, 0, 1, 1], [], []>} : vector<32x8xbf16>, vector<8x64xbf16>, vector<32x64xf32> -> vector<32x64xf32>
    %202 = arith.addf %189, %201 : vector<32x64xf32>
    %203 = vector.extract_strided_slice %110 {offsets = [0, 56], sizes = [32, 8], strides = [1, 1]} : vector<32x64xf32> to vector<32x8xf32>
    %cst_74 = arith.constant dense<0.000000e+00> : vector<32xf32>
    %204 = vector.multi_reduction <add>, %203, %cst_74 [1] : vector<32x8xf32> to vector<32xf32>
    %205 = vector.shape_cast %204 : vector<32xf32> to vector<32x1xf32>
    %206 = arith.truncf %203 : vector<32x8xf32> to vector<32x8xbf16>
    %207 = vector.extract_strided_slice %55 {offsets = [0, 56], sizes = [8, 8], strides = [1, 1]} : vector<8x64xbf16> to vector<8x8xbf16>
    %cst_75 = arith.constant dense<0.000000e+00> : vector<32x8xf32>
    %208 = tpu.matmul %206, %207, %cst_75 {dimension_numbers = #tpu.dot_dimension_numbers<[1], [0], [0], [1], [0, 0, 1, 1], [], []>} : vector<32x8xbf16>, vector<8x8xbf16>, vector<32x8xf32> -> vector<32x8xf32>
    %209 = tpu.reciprocal %205 {approx = true} : vector<32x1xf32> -> vector<32x1xf32>
    %210 = vector.broadcast %209 : vector<32x1xf32> to vector<32x8xf32>
    %211 = arith.mulf %208, %210 : vector<32x8xf32>
    %212 = arith.truncf %211 : vector<32x8xf32> to vector<32x8xbf16>
    %213 = vector.extract_strided_slice %5 {offsets = [56, 0], sizes = [8, 64], strides = [1, 1]} : vector<64x64xbf16> to vector<8x64xbf16>
    %cst_76 = arith.constant dense<0.000000e+00> : vector<32x64xf32>
    %214 = tpu.matmul %212, %213, %cst_76 {dimension_numbers = #tpu.dot_dimension_numbers<[1], [0], [0], [1], [0, 0, 1, 1], [], []>} : vector<32x8xbf16>, vector<8x64xbf16>, vector<32x64xf32> -> vector<32x64xf32>
    %215 = arith.addf %202, %214 : vector<32x64xf32>
    %216 = vector.broadcast %13 : vector<1x64xf32> to vector<32x64xf32>
    %217 = arith.addf %215, %216 : vector<32x64xf32>
    %218 = arith.truncf %217 : vector<32x64xf32> to vector<32x64xbf16>
    %cst_77 = arith.constant dense<0.000000e+00> : vector<32x256xf32>
    %219 = tpu.matmul %218, %6, %cst_77 {dimension_numbers = #tpu.dot_dimension_numbers<[1], [0], [0], [1], [0, 0, 1, 1], [], []>} : vector<32x64xbf16>, vector<64x256xbf16>, vector<32x256xf32> -> vector<32x256xf32>
    %220 = vector.broadcast %17 : vector<1x256xf32> to vector<32x256xf32>
    %221 = arith.addf %219, %220 : vector<32x256xf32>
    %cst_78 = arith.constant 0.000000e+00 : f32
    %222 = vector.broadcast %cst_78 : f32 to vector<32x256xf32>
    %223 = arith.maximumf %221, %222 : vector<32x256xf32>
    %224 = arith.truncf %223 : vector<32x256xf32> to vector<32x256xbf16>
    %cst_79 = arith.constant dense<0.000000e+00> : vector<32x64xf32>
    %225 = tpu.matmul %224, %7, %cst_79 {dimension_numbers = #tpu.dot_dimension_numbers<[1], [1], [0], [0], [0, 0, 1, 0], [], []>} : vector<32x256xbf16>, vector<64x256xbf16>, vector<32x64xf32> -> vector<32x64xf32>
    %226 = vector.broadcast %14 : vector<1x64xf32> to vector<32x64xf32>
    %227 = arith.addf %225, %226 : vector<32x64xf32>
    %228 = arith.addf %217, %227 : vector<32x64xf32>
    %cst_80 = arith.constant dense<0.000000e+00> : vector<32xf32>
    %229 = vector.multi_reduction <add>, %228, %cst_80 [1] : vector<32x64xf32> to vector<32xf32>
    %230 = vector.shape_cast %229 : vector<32xf32> to vector<32x1xf32>
    %cst_81 = arith.constant 6.400000e+01 : f32
    %231 = vector.broadcast %cst_81 : f32 to vector<32x1xf32>
    %232 = arith.divf %230, %231 : vector<32x1xf32>
    %233 = vector.broadcast %232 : vector<32x1xf32> to vector<32x64xf32>
    %234 = arith.subf %228, %233 : vector<32x64xf32>
    %235 = arith.mulf %234, %234 : vector<32x64xf32>
    %cst_82 = arith.constant dense<0.000000e+00> : vector<32xf32>
    %236 = vector.multi_reduction <add>, %235, %cst_82 [1] : vector<32x64xf32> to vector<32xf32>
    %237 = vector.shape_cast %236 : vector<32xf32> to vector<32x1xf32>
    %cst_83 = arith.constant 6.400000e+01 : f32
    %238 = vector.broadcast %cst_83 : f32 to vector<32x1xf32>
    %239 = arith.divf %237, %238 : vector<32x1xf32>
    %cst_84 = arith.constant 9.99999974E-6 : f32
    %240 = vector.broadcast %cst_84 : f32 to vector<32x1xf32>
    %241 = arith.addf %239, %240 : vector<32x1xf32>
    %242 = math.rsqrt %241 : vector<32x1xf32>
    %243 = vector.broadcast %242 : vector<32x1xf32> to vector<32x64xf32>
    %244 = arith.mulf %234, %243 : vector<32x64xf32>
    %245 = vector.broadcast %15 : vector<1x64xf32> to vector<32x64xf32>
    %246 = arith.mulf %244, %245 : vector<32x64xf32>
    %247 = vector.broadcast %16 : vector<1x64xf32> to vector<32x64xf32>
    %248 = arith.addf %246, %247 : vector<32x64xf32>
    %249 = vector.extract_strided_slice %248 {offsets = [0, 0], sizes = [16, 64], strides = [1, 1]} : vector<32x64xf32> to vector<16x64xf32>
    %250 = vector.extract_strided_slice %249 {offsets = [0, 0], sizes = [8, 64], strides = [1, 1]} : vector<16x64xf32> to vector<8x64xf32>
    %251 = vector.extract_strided_slice %249 {offsets = [8, 0], sizes = [8, 64], strides = [1, 1]} : vector<16x64xf32> to vector<8x64xf32>
    %252 = tpu.concatenate %250, %251 in 1 : vector<8x64xf32>, vector<8x64xf32> -> vector<8x128xf32>
    %c0_85 = arith.constant 0 : index
    %c0_86 = arith.constant 0 : index
    %c0_87 = arith.constant 0 : index
    %253 = vector.load %arg4[%c0_85, %c0_86, %c0_87] : memref<2x8x128xf32, #tpu.memory_space<vmem>>, vector<1x8x128xf32>
    %254 = vector.shape_cast %253 : vector<1x8x128xf32> to vector<8x128xf32>
    %255 = vector.shape_cast %252 : vector<8x128xf32> to vector<1x8x128xf32>
    tpu.vector_store %arg4[%c0_85, %c0_86, %c0_87], %255 {strides = array<i32>} : memref<2x8x128xf32, #tpu.memory_space<vmem>>, vector<1x8x128xf32>,
    %256 = vector.extract_strided_slice %248 {offsets = [16, 0], sizes = [16, 64], strides = [1, 1]} : vector<32x64xf32> to vector<16x64xf32>
    %257 = vector.extract_strided_slice %256 {offsets = [0, 0], sizes = [8, 64], strides = [1, 1]} : vector<16x64xf32> to vector<8x64xf32>
    %258 = vector.extract_strided_slice %256 {offsets = [8, 0], sizes = [8, 64], strides = [1, 1]} : vector<16x64xf32> to vector<8x64xf32>
    %259 = tpu.concatenate %257, %258 in 1 : vector<8x64xf32>, vector<8x64xf32> -> vector<8x128xf32>
    %c1_88 = arith.constant 1 : index
    %c0_89 = arith.constant 0 : index
    %c0_90 = arith.constant 0 : index
    %260 = vector.load %arg4[%c1_88, %c0_89, %c0_90] : memref<2x8x128xf32, #tpu.memory_space<vmem>>, vector<1x8x128xf32>
    %261 = vector.shape_cast %260 : vector<1x8x128xf32> to vector<8x128xf32>
    %262 = vector.shape_cast %259 : vector<8x128xf32> to vector<1x8x128xf32>
    tpu.vector_store %arg4[%c1_88, %c0_89, %c0_90], %262 {strides = array<i32>} : memref<2x8x128xf32, #tpu.memory_space<vmem>>, vector<1x8x128xf32>,
    return
  }
  func.func @transform_0(%arg0: i32) -> (i32, i32) {
    %c0_i32 = arith.constant 0 : i32
    %c0_i32_0 = arith.constant 0 : i32
    return %arg0, %c0_i32 : i32, i32
  }
  func.func @transform_1(%arg0: i32) -> (i32, i32) {
    %c0_i32 = arith.constant 0 : i32
    %c0_i32_0 = arith.constant 0 : i32
    %c0_i32_1 = arith.constant 0 : i32
    return %c0_i32, %c0_i32_0 : i32, i32
  }
  func.func @transform_2(%arg0: i32) -> (i32, i32) {
    %c0_i32 = arith.constant 0 : i32
    %c0_i32_0 = arith.constant 0 : i32
    %c0_i32_1 = arith.constant 0 : i32
    return %c0_i32, %c0_i32_0 : i32, i32
  }
  func.func @transform_3(%arg0: i32) -> (i32, i32, i32) {
    %c0_i32 = arith.constant 0 : i32
    %c0_i32_0 = arith.constant 0 : i32
    %c0_i32_1 = arith.constant 0 : i32
    return %arg0, %c0_i32, %c0_i32_0 : i32, i32, i32
  }
}

</mosaic_0001>

<bundles_post_ra>
// kernel: gem_forward.1
= control target key start
LH: loop header
LB: loop body
LE: loop exit
PB: predicated region body
PF: predicated region fallthrough
CT: control target
= control target key end

     0   :  { %s2228_s24 = smov 64   ;;  %vm88_vm0 = vcmask 523264   ;;  %vm140_vm1 = vcmask 1043456   ;;  %vm279_vm2 = vcmask 64512   ;;  %s2229_s12 = smov 112   ;;  %vm751_vm3 = vcmask 31744   ;;  %s3027_s1 = inlined_call_operand.vmem [shape: bf16[64,896], index: 1, kind: input, shape index: {}]   ;;  %s3028_s0 = inlined_call_operand.vmem [shape: f32[2,64], index: 0, kind: input, shape index: {}]   ;;  %s3029_s2 = inlined_call_operand.vmem [shape: f32[8,256], index: 2, kind: input, shape index: {}]   ;;  %s3030_s3 = inlined_call_operand.vmem [shape: f32[2,8,128], index: 3, kind: output, shape index: {}]  }
   0x1   :  { %v1957_v0 = vld [vmem:[%s3027_s1 + $0xa8] sm:$0xf]  ;;  %v2101_v1 = vld [vmem:[%s3027_s1 + $0xc0] sm:$0xf0]  ;;  %v1953_v2 = vld [vmem:[%s3027_s1 + $0x70] sm:$0xf] }
   0x2   :  { %v1958_v3 = vor.u32 %v2101_v1, %v1957_v0  ;;  %v2100_v4 = vld [vmem:[%s3027_s1 + $0x88] sm:$0xf0]  ;;  %v1949_v5 = vld [vmem:[%s3027_s1 + $0x38] sm:$0xf]  ;;  %v2099_v6 = vld [vmem:[%s3027_s1 + $0x50] sm:$0xf0] }
   0x3   :  { %v1950_v7 = vor.u32 %v2099_v6, %v1949_v5  ;;  %v1954_v8 = vor.u32 %v2100_v4, %v1953_v2  ;;  %v1945_v9 = vld [vmem:[%s3027_s1] sm:$0xf]  ;;  %v2098_v10 = vld [vmem:[%s3027_s1 + $0x18] sm:$0xf0]  ;;  %v2103_v17 = vld [vmem:[%s3027_s1 + $0x54] sm:$0xf0] }
   0x4   :  { %96 = vmatpush.bf16.msra.mxu0 %v1958_v3  ;;  %112 = vrot.lane.b32.xlu0 %v1958_v3, %s2228_s24  ;;  %v1946_v11 = vor.u32 %v2098_v10, %v1945_v9  ;;  %v62_v12 = vld [vmem:[%s3028_s0] sm:$0x3]  ;;  %v1967_v16 = vld [vmem:[%s3027_s1 + $0x3c] sm:$0xf]  ;;  %v1975_v18 = vld [vmem:[%s3027_s1 + $0xac] sm:$0xf] }
   0x5   :  { %108 = vrot.lane.b32.xlu1 %v1950_v7, %s2228_s24  ;;  %v63_v13 = vpack.c.bf16 %v62_v12, %v62_v12  ;;  %v55_v14 = vld [vmem:[%s3029_s2] ss:$0 sm:$0xff]  ;;  %v1968_v19 = vor.u32 %v2103_v17, %v1967_v16  ;;  %v2105_v20 = vld [vmem:[%s3027_s1 + $0xc4] sm:$0xf0]  ;;  %v1971_v23 = vld [vmem:[%s3027_s1 + $0x74] sm:$0xf] }
   0x6   :  { %v1976_v22 = vor.u32 %v2105_v20, %v1975_v18  ;;  %v2104_v24 = vld [vmem:[%s3027_s1 + $0x8c] sm:$0xf0]  ;;  %v1963_v27 = vld [vmem:[%s3027_s1 + $0x4] sm:$0xf]  ;;  %v2102_v28 = vld [vmem:[%s3027_s1 + $0x1c] sm:$0xf0] }
   0x7   :  { %v1972_v26 = vor.u32 %v2104_v24, %v1971_v23  ;;  %v1964_v30 = vor.u32 %v2102_v28, %v1963_v27  ;;  %v37_v35 = vld [vmem:[%s3027_s1 + $0xb0] sm:$0xf]  ;;  %v38_v36 = vld [vmem:[%s3027_s1 + $0xcc] sm:$0xf]  ;;  %v35_v40 = vld [vmem:[%s3027_s1 + $0x78] sm:$0xf] }
   0x8   :  { %97 = vmatpush.bf16.msra.mxu0 %v1954_v8  ;;  %200 = vrot.lane.b32.xlu2 %v1976_v22, %s2228_s24  ;;  %v2337_v37 = vunpack.c.l.b16 %v37_v35  ;;  %v2339_v38 = vunpack.c.l.b16 %v38_v36  ;;  %v36_v41 = vld [vmem:[%s3027_s1 + $0x94] sm:$0xf]  ;;  %v2349_v42 = vunpack.c.l.b16 %v35_v40  ;;  %v33_v48 = vld [vmem:[%s3027_s1 + $0x40] sm:$0xf]  ;;  %v34_v49 = vld [vmem:[%s3027_s1 + $0x5c] sm:$0xf] }
   0x9   :  { %178 = vmatpush.bf16.msra.mxu2 %v1976_v22  ;;  %v2351_v43 = vunpack.c.l.b16 %v36_v41  ;;  %v2361_v50 = vunpack.c.l.b16 %v33_v48  ;;  %v2363_v51 = vunpack.c.l.b16 %v34_v49  ;;  %v31_v53 = vld [vmem:[%s3027_s1 + $0x8] sm:$0xf]  ;;  %v32_v54 = vld [vmem:[%s3027_s1 + $0x24] sm:$0xf]  ;;  %s2230_s13 = smov 104   ;;  %s2231_s14 = smov 120  }
   0xa   :  { %v245_v39 = vpack.c.b16 %v2339_v38, %v2337_v37  ;;  %v2373_v55 = vunpack.c.l.b16 %v31_v53  ;;  %v2375_v56 = vunpack.c.l.b16 %v32_v54  ;;  %v56_v59 = vld [vmem:[%s3029_s2 + $0x8] ss:$0 sm:$0xff]  ;;  %s2232_s15 = smov 88   ;;  %s2233_s16 = smov 96   ;;  %v2237_v36 = vmov 1.0  }
   0xb   :  { %v244_v44 = vpack.c.b16 %v2351_v43, %v2349_v42  ;;  %v243_v52 = vpack.c.b16 %v2363_v51, %v2361_v50  ;;  %s2234_s17 = smov 72   ;;  %s2235_s18 = smov 80   ;;  %v57_v41 = vld [vmem:[%s3029_s2 + $0x1] ss:$0 sm:$0xff]  ;;  %vm697_vm4 = vcmask 130048   ;;  %vm702_vm5 = vcmask 195584  }
   0xc   :  { %98 = vmatpush.bf16.msra.mxu0 %v1950_v7  ;;  %110 = vrot.lane.b32.xlu0 %v1954_v8, %s2228_s24  ;;  %v242_v58 = vpack.c.b16 %v2375_v56, %v2373_v55  ;;  %s2238_s19 = smov 8   ;;  %s2239_s20 = smov 16   ;;  %v945_v53 = vpack.c.b16 %v2375_v56, %v2375_v56  ;;  %vm707_vm6 = vcmask 261120   ;;  %vm712_vm7 = vcmask 326656  }
   0xd   :  { %106 = vrot.lane.b32.xlu1 %v1946_v11, %s2228_s24  ;;  %179 = vmatpush.bf16.msra.mxu2 %v1972_v26  ;;  %s2240_s21 = smov 48   ;;  %s2241_s25 = smov 40   ;;  %vm717_vm8 = vcmask 392192   ;;  %vm722_vm9 = vcmask 457728  }
   0xe   :  { %s2242_s26 = smov 24   ;;  %s2243_s27 = smov 56  }
   0xf   :  { %s2244_s28 = smov 32  }
  0x10   :  { %99 = vmatpush.bf16.msra.mxu0 %v1946_v11  ;;  %198 = vrot.lane.b32.xlu2 %v1972_v26, %s2228_s24 }
  0x11   :  { %180 = vmatpush.bf16.msra.mxu2 %v1968_v19 }
  0x13   :  { %1959 = vmatmul.msk.bf16.vlgmr.msra.gmra.mxu0 %vm88_vm0, %v63_v13 }
  0x14   :  { %119 = vrot.lane.b32.xlu0 %v55_v14, %s2228_s24  ;;  %254 = vmatpush.bf16.msrb.mxu0 %v245_v39  ;;  %v2414_v39 = vsel %vm751_vm3, 0.0, %v2237_v36 }
  0x15   :  { %196 = vrot.lane.b32.xlu1 %v1968_v19, %s2228_s24  ;;  %181 = vmatpush.bf16.msra.mxu2 %v1964_v30 }
  0x18   :  { %194 = vrot.lane.b32.xlu2 %v1964_v30, %s2228_s24  ;;  %255 = vmatpush.bf16.msrb.mxu0 %v244_v44 }
  0x1c   :  { %256 = vmatpush.bf16.msrb.mxu0 %v243_v52  ;;  %207 = vrot.lane.b32.xlu0 %v56_v59, %s2228_s24 }
  0x20   :  { %257 = vmatpush.bf16.msrb.mxu0 %v242_v58 }
  0x62   :  { %v201_v45 = vpop.permute.xlu2 %200 }
  0x63   :  { %217 = vmatpush.bf16.msra.mxu3 %v201_v45 }
  0x6a   :  { %v199_v46 = vpop.permute.xlu2 %198 }
  0x6b   :  { %218 = vmatpush.bf16.msra.mxu3 %v199_v46 }
  0x72   :  { %v195_v57 = vpop.permute.xlu2 %194 }
  0x76   :  { %v113_v15 = vpop.permute.xlu0 %112 }
  0x77   :  { %129 = vmatpush.bf16.msra.mxu1 %v113_v15  ;;  %v109_v21 = vpop.permute.xlu1 %108 }
  0x7e   :  { %v111_v25 = vpop.permute.xlu0 %110 }
  0x7f   :  { %130 = vmatpush.bf16.msra.mxu1 %v111_v25  ;;  %v107_v29 = vpop.permute.xlu1 %106 }
  0x83   :  { %131 = vmatpush.bf16.msra.mxu1 %v109_v21 }
  0x86   :  { %v120_v60 = vpop.permute.xlu0 %119 }
  0x87   :  { %132 = vmatpush.bf16.msra.mxu1 %v107_v29  ;;  %v197_v47 = vpop.permute.xlu1 %196 }
  0x88   :  { %219 = vmatpush.bf16.msra.mxu3 %v197_v47 }
  0x8c   :  { %220 = vmatpush.bf16.msra.mxu3 %v195_v57 }
  0x8e   :  { %v208_v7 = vpop.permute.xlu0 %207 }
  0x90   :  { %v101_v31 = vpop.f32.mrf.mxu0 }
  0x91   :  { %v102_v32 = vadd.f32 %v101_v31, %v55_v14 }
  0x93   :  { %v105_v33 = vpack.c.bf16 %v102_v32, %v102_v32 }
  0x95   :  { %1960 = vmatmul.msk.bf16.vlgmr.msra.gmra.mxu1 %vm88_vm0, %v105_v33 }
  0x98   :  { %v103_v34 = vpop.f32.mrf.mxu0 }
  0x99   :  { %v2236_v34 = vmov 0.0  }
  0x9a   :  { %v2412_v35 = vsel %vm751_vm3, 1.0, %v2236_v34 }
  0x9b   :  { %v2140_v40 = vpack.i.bf16 %v2414_v39, %v2412_v35 }
 0x112   :  { %v134_v61 = vpop.f32.mrf.mxu1 }
 0x113   :  { %v135_v62 = vadd.f32 %v134_v61, %v120_v60 }
 0x115   :  { %v138_v63 = vperm.slane %v135_v62, 0  ;;  %v139_v0 = vperm.slane %v135_v62, 1 }
 0x117   :  { %v142_v1 = vpack.c.bf16 %v138_v63, %v138_v63  ;;  %v141_v2 = vsel %vm140_vm1, %v138_v63, %v139_v0  ;;  %v143_v5 = vpack.c.bf16 %v139_v0, %v139_v0 }
 0x118   :  { %v193_v3 = vpack.c.bf16 %v141_v2, %v141_v2 }
 0x119   :  { %1977 = vmatmul.msk.bf16.vlgmr.msra.gmra.mxu2 %vm88_vm0, %v142_v1 }
 0x11a   :  { %v136_v4 = vpop.f32.mrf.mxu1  ;;  %1979 = vmatmul.msk.bf16.vlgmr.msra.gmra.mxu3 %vm88_vm0, %v193_v3  ;;  %1980 = vmatmul.msk.bf16.vlgmr.msrb.gmra.mxu0 %vm88_vm0, %v193_v3 }
 0x129   :  { %1978 = vmatmul.msk.bf16.gmra.mxu2 %vm88_vm0, %v143_v5 }
 0x197   :  { %v2388_v6 = vpop.f32.mrf.mxu0 }
 0x198   :  { %v260_v44 = vadd.f32 %v2388_v6, %v57_v41 }
 0x19a   :  { %v268_v45 = vpack.c.bf16 %v260_v44, %v260_v44 }
 0x19c   :  { %v183_v8 = vpop.f32.mrf.mxu2  ;;  %v903_v46 = vunpack.c.l.b16 %v268_v45 }
 0x19d   :  { %v222_v9 = vpop.f32.mrf.mxu3  ;;  %v184_v13 = vadd.f32 %v183_v8, %v56_v59 }
 0x19e   :  { %v223_v10 = vadd.f32 %v222_v9, %v208_v7  ;;  %v904_v47 = vpack.c.b16 %v903_v46, %v903_v46  ;;  %v837_v9 = vsel %vm140_vm1, %v268_v45, 0 }
 0x19f   :  { %v261_v11 = vpop.f32.mrf.mxu0  ;;  %v263_v18 = vpack.c.bf16 %v184_v13, %v184_v13 }
 0x1a0   :  { %v267_v12 = vpack.c.bf16 %v223_v10, %v223_v10 }
 0x1a1   :  { %v273_v22 = vunpack.c.l.b16 %v263_v18 }
 0x1a2   :  { %v317_v14 = vunpack.c.l.b16 %v267_v12  ;;  %v287_v15 = vsel %vm279_vm2, %v267_v12, 0 }
 0x1a3   :  { %296 = vmatpush.bf16.xpose.msrb.mxu1 %v287_v15 }
 0x1a4   :  { %v318_v16 = vpack.c.b16 %v317_v14, %v317_v14  ;;  %v185_v17 = vpop.f32.mrf.mxu2 }
 0x1a5   :  { %v186_v19 = vadd.f32 %v185_v17, %v56_v59  ;;  %v224_v20 = vpop.f32.mrf.mxu3 }
 0x1a6   :  { %357 = vrot.lane.b32.xlu0 %v318_v16, %s2229_s12  ;;  %395 = vrot.lane.b32.xlu2 %v318_v16, %s2230_s13 }
 0x1a7   :  { %v264_v21 = vpack.c.bf16 %v186_v19, %v186_v19  ;;  %319 = vrot.lane.b32.xlu1 %v318_v16, %s2231_s14 }
 0x1a9   :  { %v274_v23 = vunpack.c.l.b16 %v264_v21 }
 0x1ab   :  { %v277_v24 = vpack.c.b16 %v274_v23, %v273_v22 }
 0x1ac   :  { %v188_v25 = vpop.f32.mrf.mxu2 }
 0x1ad   :  { %1981 = vmatmul.msk.bf16.vlgmr.msrb.gmra.mxu1 %vm279_vm2, %v277_v24  ;;  %v189_v26 = vadd.f32 %v188_v25, %v56_v59 }
 0x1ae   :  { %353 = vrot.lane.b32.xlu0 %v277_v24, %s2229_s12  ;;  %391 = vrot.lane.b32.xlu2 %v277_v24, %s2230_s13 }
 0x1af   :  { %312 = vrot.lane.b32.xlu1 %v277_v24, %s2231_s14  ;;  %v265_v28 = vpack.c.bf16 %v189_v26, %v189_v26 }
 0x1b1   :  { %v275_v31 = vunpack.c.l.b16 %v265_v28 }
 0x1b4   :  { %v190_v27 = vpop.f32.mrf.mxu2 }
 0x1b5   :  { %v191_v29 = vadd.f32 %v190_v27, %v56_v59 }
 0x1b7   :  { %v266_v30 = vpack.c.bf16 %v191_v29, %v191_v29  ;;  %471 = vrot.lane.b32.xlu1 %v318_v16, %s2232_s15 }
 0x1b9   :  { %v276_v32 = vunpack.c.l.b16 %v266_v30 }
 0x1bb   :  { %v278_v33 = vpack.c.b16 %v276_v32, %v275_v31 }
 0x1bd   :  { %355 = vrot.lane.b32.xlu0 %v278_v33, %s2229_s12  ;;  %393 = vrot.lane.b32.xlu2 %v278_v33, %s2230_s13 }
 0x1be   :  { %1982 = vmatmul.msk.bf16.gmra.mxu1 %vm279_vm2, %v278_v33 }
 0x1bf   :  { %314 = vrot.lane.b32.xlu1 %v278_v33, %s2231_s14 }
 0x1c5   :  { %433 = vrot.lane.b32.xlu0 %v318_v16, %s2233_s16  ;;  %547 = vrot.lane.b32.xlu2 %v318_v16, %s2234_s17 }
 0x1c7   :  { %509 = vrot.lane.b32.xlu1 %v318_v16, %s2235_s18 }
 0x1cd   :  { %543 = vrot.lane.b32.xlu0 %v277_v24, %s2234_s17  ;;  %467 = vrot.lane.b32.xlu2 %v277_v24, %s2232_s15 }
 0x1cf   :  { %429 = vrot.lane.b32.xlu1 %v277_v24, %s2233_s16 }
 0x1d5   :  { %469 = vrot.lane.b32.xlu0 %v278_v33, %s2232_s15  ;;  %505 = vrot.lane.b32.xlu2 %v277_v24, %s2235_s18 }
 0x1d7   :  { %545 = vrot.lane.b32.xlu1 %v278_v33, %s2234_s17 }
 0x1dd   :  { %507 = vrot.lane.b32.xlu0 %v278_v33, %s2235_s18  ;;  %431 = vrot.lane.b32.xlu2 %v278_v33, %s2233_s16 }
 0x1df   :  { %2141 = vrot.lane.b32.xlu1 %v2140_v40, %s2238_s19 }
 0x1e5   :  { %764 = vrot.lane.b32.xlu0 %v2414_v39, %s2239_s20  ;;  %786 = vrot.lane.b32.xlu2 %v2412_v35, %s2240_s21 }
 0x1e7   :  { %762 = vrot.lane.b32.xlu1 %v2412_v35, %s2239_s20 }
 0x1ed   :  { %782 = vrot.lane.b32.xlu0 %v2414_v39, %s2241_s25  ;;  %770 = vrot.lane.b32.xlu2 %v2414_v39, %s2242_s26 }
 0x1ef   :  { %768 = vrot.lane.b32.xlu1 %v2412_v35, %s2242_s26 }
 0x1f5   :  { %794 = vrot.lane.b32.xlu0 %v2414_v39, %s2243_s27  ;;  %776 = vrot.lane.b32.xlu2 %v2414_v39, %s2244_s28 }
 0x1f7   :  { %774 = vrot.lane.b32.xlu1 %v2412_v35, %s2244_s28 }
 0x1fd   :  { %1035 = vrot.lane.b32.xlu0 %v904_v47, %s2229_s12  ;;  %788 = vrot.lane.b32.xlu2 %v2414_v39, %s2240_s21 }
 0x1ff   :  { %780 = vrot.lane.b32.xlu1 %v2412_v35, %s2241_s25 }
 0x200   :  { %v396_v48 = vpop.permute.xlu2 %395 }
 0x201   :  { %v404_v49 = vsel %vm279_vm2, %v396_v48, 0 }
 0x202   :  { %413 = vmatpush.bf16.xpose.msrb.mxu2 %v404_v49 }
 0x205   :  { %1344 = vrot.lane.b32.xlu0 %v904_v47, %s2232_s15  ;;  %905 = vrot.lane.b32.xlu2 %v904_v47, %s2231_s14 }
 0x207   :  { %792 = vrot.lane.b32.xlu1 %v2412_v35, %s2243_s27 }
 0x208   :  { %v392_v52 = vpop.permute.xlu2 %391 }
 0x209   :  { %1987 = vmatmul.msk.bf16.vlgmr.msrb.gmra.mxu2 %vm279_vm2, %v392_v52 }
 0x20d   :  { %1550 = vrot.lane.b32.xlu0 %v904_v47, %s2234_s17  ;;  %1138 = vrot.lane.b32.xlu2 %v904_v47, %s2230_s13 }
 0x20f   :  { %946 = vrot.lane.b32.xlu1 %v945_v53, %s2228_s24 }
 0x215   :  { %1241 = vrot.lane.b32.xlu2 %v904_v47, %s2233_s16 }
 0x217   :  { %v394_v54 = vpop.permute.xlu2 %393 }
 0x218   :  { %v358_v57 = vpop.permute.xlu0 %357 }
 0x219   :  { %v366_v58 = vsel %vm279_vm2, %v358_v57, 0  ;;  %v320_v59 = vpop.permute.xlu1 %319  ;;  %1988 = vmatmul.msk.bf16.gmra.mxu2 %vm279_vm2, %v394_v54 }
 0x21a   :  { %v328_v60 = vsel %vm279_vm2, %v320_v59, 0  ;;  %375 = vmatpush.bf16.xpose.msra.mxu0 %v366_v58 }
 0x21b   :  { %337 = vmatpush.bf16.xpose.msrb.mxu3 %v328_v60 }
 0x21d   :  { %1447 = vrot.lane.b32.xlu2 %v904_v47, %s2235_s18 }
 0x21f   :  { %v548_v56 = vpop.permute.xlu2 %547 }
 0x220   :  { %v556_v61 = vsel %vm279_vm2, %v548_v56, 0  ;;  %v354_v62 = vpop.permute.xlu0 %353 }
 0x221   :  { %v313_v63 = vpop.permute.xlu1 %312  ;;  %1985 = vmatmul.msk.bf16.vlgmr.msra.gmra.mxu0 %vm279_vm2, %v354_v62  ;;  %565 = vmatpush.bf16.xpose.msra.mxu2 %v556_v61 }
 0x222   :  { %1983 = vmatmul.msk.bf16.vlgmr.msrb.gmra.mxu3 %vm279_vm2, %v313_v63 }
 0x227   :  { %v468_v0 = vpop.permute.xlu2 %467 }
 0x229   :  { %v472_v1 = vpop.permute.xlu1 %471 }
 0x22a   :  { %v480_v2 = vsel %vm279_vm2, %v472_v1, 0  ;;  %v2506_v63 = vpop.f32.mrf.mxu1 }
 0x22b   :  { %489 = vmatpush.bf16.xpose.msra.mxu3 %v480_v2 }
 0x22f   :  { %v356_v3 = vpop.permute.xlu0 %355  ;;  %v506_v4 = vpop.permute.xlu2 %505 }
 0x231   :  { %v315_v5 = vpop.permute.xlu1 %314  ;;  %1986 = vmatmul.msk.bf16.gmra.mxu0 %vm279_vm2, %v356_v3 }
 0x232   :  { %1984 = vmatmul.msk.bf16.gmra.mxu3 %vm279_vm2, %v315_v5  ;;  %v2509_v2 = vpop.f32.mrf.mxu1 }
 0x237   :  { %v434_v6 = vpop.permute.xlu0 %433  ;;  %v432_v7 = vpop.permute.xlu2 %431 }
 0x238   :  { %v442_v8 = vsel %vm279_vm2, %v434_v6, 0 }
 0x239   :  { %v510_v10 = vpop.permute.xlu1 %509  ;;  %451 = vmatpush.bf16.xpose.msra.mxu1 %v442_v8 }
 0x23a   :  { %v518_v11 = vsel %vm279_vm2, %v510_v10, 0 }
 0x23b   :  { %527 = vmatpush.bf16.xpose.msrb.mxu0 %v518_v11  ;;  %v2512_v5 = vpop.f32.mrf.mxu1 }
 0x23f   :  { %v544_v12 = vpop.permute.xlu0 %543  ;;  %v787_v13 = vpop.permute.xlu2 %786 }
 0x240   :  { %1995 = vmatmul.msk.bf16.vlgmr.msra.gmra.mxu2 %vm279_vm2, %v544_v12 }
 0x241   :  { %846 = vmatpush.bf16.msrb.mxu1 %v837_v9  ;;  %v430_v14 = vpop.permute.xlu1 %429 }
 0x242   :  { %1989 = vmatmul.msk.bf16.vlgmr.msra.gmra.mxu1 %vm279_vm2, %v430_v14  ;;  %1991 = vmatmul.msk.bf16.vlgmr.msra.gmra.mxu3 %vm279_vm2, %v468_v0 }
 0x243   :  { %1993 = vmatmul.msk.bf16.vlgmr.msrb.gmra.mxu0 %vm279_vm2, %v506_v4  ;;  %v2514_v6 = vpop.f32.mrf.mxu1 }
 0x247   :  { %v470_v15 = vpop.permute.xlu0 %469  ;;  %v771_v16 = vpop.permute.xlu2 %770 }
 0x249   :  { %v546_v17 = vpop.permute.xlu1 %545 }
 0x24f   :  { %v508_v18 = vpop.permute.xlu0 %507  ;;  %v777_v19 = vpop.permute.xlu2 %776 }
 0x250   :  { %1996 = vmatmul.msk.bf16.gmra.mxu2 %vm279_vm2, %v546_v17 }
 0x251   :  { %v2142_v20 = vpop.permute.xlu1 %2141 }
 0x252   :  { %v2144_v21 = vunpack.i.h.bf16 %v2142_v20  ;;  %1990 = vmatmul.msk.bf16.gmra.mxu1 %vm279_vm2, %v432_v7  ;;  %1992 = vmatmul.msk.bf16.gmra.mxu3 %vm279_vm2, %v470_v15  ;;  %v2143_v22 = vunpack.i.l.bf16 %v2142_v20 }
 0x253   :  { %1994 = vmatmul.msk.bf16.gmra.mxu0 %vm279_vm2, %v508_v18 }
 0x254   :  { %v799_v23 = vsel %vm279_vm2, %v2414_v39, %v2144_v21  ;;  %v798_v26 = vsel %vm279_vm2, %v2412_v35, %v2143_v22 }
 0x257   :  { %v765_v24 = vpop.permute.xlu0 %764  ;;  %v789_v25 = vpop.permute.xlu2 %788 }
 0x258   :  { %v801_v27 = vsel %vm697_vm4, %v799_v23, %v765_v24 }
 0x259   :  { %v763_v28 = vpop.permute.xlu1 %762  ;;  %v803_v29 = vsel %vm702_vm5, %v801_v27, %v771_v16 }
 0x25a   :  { %v800_v30 = vsel %vm697_vm4, %v798_v26, %v763_v28  ;;  %v805_v31 = vsel %vm707_vm6, %v803_v29, %v777_v19 }
 0x25f   :  { %v783_v32 = vpop.permute.xlu0 %782  ;;  %v906_v33 = vpop.permute.xlu2 %905 }
 0x260   :  { %v807_v34 = vsel %vm712_vm7, %v805_v31, %v783_v32  ;;  %v914_v36 = vsel %vm140_vm1, %v906_v33, 0 }
 0x261   :  { %v769_v39 = vpop.permute.xlu1 %768  ;;  %923 = vmatpush.bf16.msrb.mxu3 %v914_v36  ;;  %v809_v40 = vsel %vm717_vm8, %v807_v34, %v789_v25 }
 0x262   :  { %v802_v35 = vsel %vm702_vm5, %v800_v30, %v769_v39 }
 0x267   :  { %v795_v41 = vpop.permute.xlu0 %794  ;;  %v1139_v58 = vpop.permute.xlu2 %1138 }
 0x268   :  { %v2494_v44 = vsel %vm722_vm9, %v809_v40, %v795_v41  ;;  %v1147_v56 = vsel %vm140_vm1, %v1139_v58, 0 }
 0x269   :  { %v775_v45 = vpop.permute.xlu1 %774 }
 0x26a   :  { %v804_v46 = vsel %vm707_vm6, %v802_v35, %v775_v45 }
 0x26f   :  { %v1036_v47 = vpop.permute.xlu0 %1035 }
 0x270   :  { %v1044_v48 = vsel %vm140_vm1, %v1036_v47, 0 }
 0x271   :  { %v781_v49 = vpop.permute.xlu1 %780  ;;  %1053 = vmatpush.bf16.msra.mxu1 %v1044_v48 }
 0x272   :  { %v806_v52 = vsel %vm712_vm7, %v804_v46, %v781_v49 }
 0x273   :  { %v808_v53 = vsel %vm717_vm8, %v806_v52, %v787_v13 }
 0x279   :  { %v793_v54 = vpop.permute.xlu1 %792 }
 0x27a   :  { %v2501_v57 = vsel %vm722_vm9, %v808_v53, %v793_v54 }
 0x281   :  { %v947_v59 = vpop.permute.xlu1 %946 }
 0x282   :  { %v955_v60 = vsel %vm140_vm1, %v947_v59, 0 }
 0x283   :  { %964 = vmatpush.bf16.msra.mxu0 %v955_v60 }
 0x287   :  { %1156 = vmatpush.bf16.msrb.mxu0 %v1147_v56 }
 0x28c   :  { %v415_v61 = vpop.f32.mrf.mxu2 }
 0x28d   :  { %v425_v62 = vmul.f32 0.35355338, %v415_v61 }
 0x28f   :  { %617 = vrot.lane.b32.xlu2 %v425_v62, %s2242_s26 }
 0x294   :  { %v417_v3 = vpop.f32.mrf.mxu2 }
 0x295   :  { %v426_v4 = vmul.f32 0.35355338, %v417_v3 }
 0x29c   :  { %v420_v18 = vpop.f32.mrf.mxu2 }
 0x29d   :  { %v427_v24 = vmul.f32 0.35355338, %v420_v18 }
 0x29e   :  { %v377_v0 = vpop.f32.mrf.mxu0 }
 0x29f   :  { %v387_v1 = vmul.f32 0.35355338, %v377_v0 }
 0x2a1   :  { %601 = vrot.lane.b32.xlu0 %v387_v1, %s2239_s20 }
 0x2a4   :  { %v422_v27 = vpop.f32.mrf.mxu2 }
 0x2a5   :  { %v339_v7 = vpop.f32.mrf.mxu3  ;;  %v428_v30 = vmul.f32 0.35355338, %v422_v27 }
 0x2a6   :  { %v379_v10 = vpop.f32.mrf.mxu0  ;;  %v349_v13 = vmul.f32 0.35355338, %v339_v7  ;;  %v2543_v7 = vpop.permute.xlu0 %1344 }
 0x2a7   :  { %v388_v19 = vmul.f32 0.35355338, %v379_v10 }
 0x2a9   :  { %619 = vrot.lane.b32.xlu0 %v426_v4, %s2242_s26  ;;  %v2541_v4 = vpop.permute.xlu2 %1241 }
 0x2ad   :  { %v341_v11 = vpop.f32.mrf.mxu3 }
 0x2ae   :  { %v382_v15 = vpop.f32.mrf.mxu0  ;;  %v350_v20 = vmul.f32 0.35355338, %v341_v11 }
 0x2af   :  { %v389_v25 = vmul.f32 0.35355338, %v382_v15 }
 0x2b5   :  { %v344_v16 = vpop.f32.mrf.mxu3 }
 0x2b6   :  { %v384_v22 = vpop.f32.mrf.mxu0  ;;  %v351_v26 = vmul.f32 0.35355338, %v344_v16 }
 0x2b7   :  { %v390_v33 = vmul.f32 0.35355338, %v384_v22 }
 0x2bd   :  { %v346_v23 = vpop.f32.mrf.mxu3 }
 0x2be   :  { %v352_v36 = vmul.f32 0.35355338, %v346_v23 }
 0x2bf   :  { %v453_v8 = vpop.f32.mrf.mxu1 }
 0x2c0   :  { %v463_v9 = vmul.f32 0.35355338, %v453_v8  ;;  %v529_v29 = vpop.f32.mrf.mxu0  ;;  %v2545_v8 = vpop.permute.xlu2 %1447 }
 0x2c1   :  { %v539_v39 = vmul.f32 0.35355338, %v529_v29 }
 0x2c2   :  { %633 = vrot.lane.b32.xlu1 %v463_v9, %s2244_s28  ;;  %v2547_v9 = vpop.permute.xlu0 %1550 }
 0x2c3   :  { %v567_v34 = vpop.f32.mrf.mxu2 }
 0x2c4   :  { %v577_v46 = vmul.f32 0.35355338, %v567_v34  ;;  %v309_v34 = vmul.f32 0.35355338, %v2509_v2 }
 0x2c5   :  { %v491_v31 = vpop.f32.mrf.mxu3 }
 0x2c6   :  { %v501_v35 = vmul.f32 0.35355338, %v491_v31 }
 0x2c7   :  { %v455_v12 = vpop.f32.mrf.mxu1 }
 0x2c8   :  { %v464_v14 = vmul.f32 0.35355338, %v455_v12  ;;  %v531_v40 = vpop.f32.mrf.mxu0 }
 0x2c9   :  { %v540_v48 = vmul.f32 0.35355338, %v531_v40 }
 0x2ca   :  { %585 = vrot.lane.b32.xlu1 %v349_v13, %s2238_s19  ;;  %635 = vrot.lane.b32.xlu2 %v464_v14, %s2244_s28 }
 0x2cb   :  { %v569_v45 = vpop.f32.mrf.mxu2 }
 0x2cc   :  { %v578_v47 = vmul.f32 0.35355338, %v569_v45 }
 0x2cd   :  { %v493_v41 = vpop.f32.mrf.mxu3 }
 0x2ce   :  { %v502_v54 = vmul.f32 0.35355338, %v493_v41 }
 0x2cf   :  { %v458_v17 = vpop.f32.mrf.mxu1 }
 0x2d0   :  { %v465_v21 = vmul.f32 0.35355338, %v458_v17  ;;  %v534_v49 = vpop.f32.mrf.mxu0 }
 0x2d1   :  { %v541_v61 = vmul.f32 0.35355338, %v534_v49 }
 0x2d2   :  { %603 = vrot.lane.b32.xlu1 %v388_v19, %s2239_s20  ;;  %587 = vrot.lane.b32.xlu2 %v350_v20, %s2238_s19 }
 0x2d3   :  { %637 = vrot.lane.b32.xlu0 %v465_v21, %s2244_s28  ;;  %v572_v53 = vpop.f32.mrf.mxu2 }
 0x2d4   :  { %v579_v59 = vmul.f32 0.35355338, %v572_v53  ;;  %v311_v53 = vmul.f32 0.35355338, %v2514_v6 }
 0x2d5   :  { %v496_v52 = vpop.f32.mrf.mxu3 }
 0x2d6   :  { %v503_v58 = vmul.f32 0.35355338, %v496_v52 }
 0x2d7   :  { %v460_v28 = vpop.f32.mrf.mxu1 }
 0x2d8   :  { %v466_v32 = vmul.f32 0.35355338, %v460_v28  ;;  %v536_v60 = vpop.f32.mrf.mxu0 }
 0x2d9   :  { %v542_v62 = vmul.f32 0.35355338, %v536_v60 }
 0x2da   :  { %621 = vrot.lane.b32.xlu1 %v427_v24, %s2242_s26  ;;  %605 = vrot.lane.b32.xlu2 %v389_v25, %s2239_s20  ;;  %v308_v24 = vmul.f32 0.35355338, %v2506_v63 }
 0x2db   :  { %589 = vrot.lane.b32.xlu0 %v351_v26, %s2238_s19  ;;  %v574_v1 = vpop.f32.mrf.mxu2 }
 0x2dc   :  { %v580_v3 = vmul.f32 0.35355338, %v574_v1 }
 0x2dd   :  { %v498_v56 = vpop.f32.mrf.mxu3 }
 0x2de   :  { %v504_v0 = vmul.f32 0.35355338, %v498_v56 }
 0x2e2   :  { %623 = vrot.lane.b32.xlu2 %v428_v30, %s2242_s26  ;;  %639 = vrot.lane.b32.xlu1 %v466_v32, %s2244_s28 }
 0x2e3   :  { %607 = vrot.lane.b32.xlu0 %v390_v33, %s2239_s20 }
 0x2e9   :  { %v618_v10 = vpop.permute.xlu2 %617 }
 0x2ea   :  { %665 = vrot.lane.b32.xlu2 %v539_v39, %s2240_s21  ;;  %591 = vrot.lane.b32.xlu1 %v352_v36, %s2238_s19 }
 0x2eb   :  { %649 = vrot.lane.b32.xlu0 %v501_v35, %s2241_s25 }
 0x2f2   :  { %683 = vrot.lane.b32.xlu2 %v578_v47, %s2243_s27  ;;  %681 = vrot.lane.b32.xlu1 %v577_v46, %s2243_s27  ;;  %v310_v47 = vmul.f32 0.35355338, %v2512_v5 }
 0x2f3   :  { %667 = vrot.lane.b32.xlu0 %v540_v48, %s2240_s21 }
 0x2fa   :  { %653 = vrot.lane.b32.xlu2 %v503_v58, %s2241_s25  ;;  %651 = vrot.lane.b32.xlu1 %v502_v54, %s2241_s25 }
 0x2fb   :  { %685 = vrot.lane.b32.xlu0 %v579_v59, %s2243_s27 }
 0x302   :  { %671 = vrot.lane.b32.xlu2 %v542_v62, %s2240_s21  ;;  %669 = vrot.lane.b32.xlu1 %v541_v61, %s2240_s21 }
 0x303   :  { %655 = vrot.lane.b32.xlu0 %v504_v0, %s2241_s25 }
 0x30a   :  { %687 = vrot.lane.b32.xlu1 %v580_v3, %s2243_s27 }
 0x313   :  { %v602_v11 = vpop.permute.xlu0 %601 }
 0x31b   :  { %v620_v15 = vpop.permute.xlu0 %619 }
 0x324   :  { %v636_v13 = vpop.permute.xlu2 %635 }
 0x32c   :  { %v588_v16 = vpop.permute.xlu2 %587 }
 0x32d   :  { %v694_v63 = vsel %vm279_vm2, %v309_v34, %v588_v16 }
 0x334   :  { %v634_v12 = vpop.permute.xlu1 %633  ;;  %v606_v19 = vpop.permute.xlu2 %605 }
 0x33c   :  { %v586_v14 = vpop.permute.xlu1 %585  ;;  %v624_v22 = vpop.permute.xlu2 %623 }
 0x33d   :  { %v693_v26 = vsel %vm279_vm2, %v308_v24, %v586_v14 }
 0x33e   :  { %v698_v27 = vsel %vm697_vm4, %v693_v26, %v602_v11 }
 0x33f   :  { %v703_v30 = vsel %vm702_vm5, %v698_v27, %v618_v10 }
 0x340   :  { %v708_v32 = vsel %vm707_vm6, %v703_v30, %v634_v12 }
 0x344   :  { %v604_v17 = vpop.permute.xlu1 %603  ;;  %v666_v29 = vpop.permute.xlu2 %665 }
 0x345   :  { %v638_v18 = vpop.permute.xlu0 %637  ;;  %v699_v41 = vsel %vm697_vm4, %v694_v63, %v604_v17 }
 0x346   :  { %v704_v48 = vsel %vm702_vm5, %v699_v41, %v620_v15  ;;  %v1250_v41 = vsel %vm140_vm1, %v2541_v4, 0 }
 0x347   :  { %v709_v49 = vsel %vm707_vm6, %v704_v48, %v636_v13 }
 0x34c   :  { %v622_v20 = vpop.permute.xlu1 %621  ;;  %v684_v46 = vpop.permute.xlu2 %683 }
 0x34d   :  { %v590_v21 = vpop.permute.xlu0 %589 }
 0x34e   :  { %v695_v2 = vsel %vm279_vm2, %v310_v47, %v590_v21 }
 0x34f   :  { %v700_v54 = vsel %vm697_vm4, %v695_v2, %v606_v19  ;;  %v976_v2 = vpack.c.b16 %v2373_v55, %v2373_v55 }
 0x350   :  { %v705_v61 = vsel %vm702_vm5, %v700_v54, %v622_v20 }
 0x351   :  { %v710_v6 = vsel %vm707_vm6, %v705_v61, %v638_v18 }
 0x354   :  { %v640_v23 = vpop.permute.xlu1 %639  ;;  %v654_v0 = vpop.permute.xlu2 %653 }
 0x355   :  { %v608_v25 = vpop.permute.xlu0 %607  ;;  %v715_v3 = vsel %vm712_vm7, %v710_v6, %v654_v0 }
 0x35c   :  { %v592_v28 = vpop.permute.xlu1 %591  ;;  %v672_v19 = vpop.permute.xlu2 %671 }
 0x35d   :  { %v650_v31 = vpop.permute.xlu0 %649  ;;  %v696_v56 = vsel %vm279_vm2, %v311_v53, %v592_v28  ;;  %v1075_v53 = vpack.c.b16 %v2361_v50, %v2361_v50 }
 0x35e   :  { %v713_v33 = vsel %vm712_vm7, %v708_v32, %v650_v31  ;;  %v701_v1 = vsel %vm697_vm4, %v696_v56, %v608_v25 }
 0x35f   :  { %v718_v39 = vsel %vm717_vm8, %v713_v33, %v666_v29  ;;  %v706_v11 = vsel %vm702_vm5, %v701_v1, %v624_v22 }
 0x360   :  { %v711_v16 = vsel %vm707_vm6, %v706_v11, %v640_v23 }
 0x364   :  { %v682_v36 = vpop.permute.xlu1 %681 }
 0x365   :  { %v668_v35 = vpop.permute.xlu0 %667  ;;  %v723_v40 = vsel %vm722_vm9, %v718_v39, %v682_v36 }
 0x366   :  { %v727_v45 = vsel %vm88_vm0, %v723_v40, -inf }
 0x367   :  { %728 = vmax.xlane.f32.xlu2 %v727_v45 }
 0x36c   :  { %v652_v52 = vpop.permute.xlu1 %651 }
 0x36d   :  { %v686_v58 = vpop.permute.xlu0 %685  ;;  %v714_v59 = vsel %vm712_vm7, %v709_v49, %v652_v52 }
 0x36e   :  { %v719_v60 = vsel %vm717_vm8, %v714_v59, %v668_v35 }
 0x36f   :  { %v724_v5 = vsel %vm722_vm9, %v719_v60, %v684_v46  ;;  %v1178_v60 = vpack.c.b16 %v2363_v51, %v2363_v51 }
 0x370   :  { %v730_v62 = vsel %vm88_vm0, %v724_v5, -inf }
 0x371   :  { %731 = vmax.xlane.f32.xlu0 %v730_v62 }
 0x374   :  { %v670_v10 = vpop.permute.xlu1 %669 }
 0x375   :  { %v720_v12 = vsel %vm717_vm8, %v715_v3, %v670_v10  ;;  %v656_v13 = vpop.permute.xlu0 %655 }
 0x376   :  { %v725_v14 = vsel %vm722_vm9, %v720_v12, %v686_v58  ;;  %v716_v17 = vsel %vm712_vm7, %v711_v16, %v656_v13 }
 0x377   :  { %v733_v15 = vsel %vm88_vm0, %v725_v14, -inf  ;;  %v721_v18 = vsel %vm717_vm8, %v716_v17, %v672_v19 }
 0x379   :  { %734 = vmax.xlane.f32.xlu0 %v733_v15 }
 0x37c   :  { %v688_v20 = vpop.permute.xlu1 %687 }
 0x37d   :  { %v726_v21 = vsel %vm722_vm9, %v721_v18, %v688_v20 }
 0x37e   :  { %v736_v22 = vsel %vm88_vm0, %v726_v21, -inf }
 0x37f   :  { %737 = vmax.xlane.f32.xlu1 %v736_v22 }
 0x3da   :  { %v729_v24 = vpop.xlane.xlu2 %728 }
 0x3db   :  { %v739_v25 = vsub.f32 %v723_v40, %v729_v24 }
 0x3dd   :  { %v743_v26 = vmul.f32 1.442695, %v739_v25 }
 0x3df   :  { %2145 = vpow2.f32 %v743_v26 }
 0x3e4   :  { %v732_v27 = vpop.xlane.xlu0 %731 }
 0x3e5   :  { %v2146_v28 = vpop.eup %2145  ;;  %v740_v29 = vsub.f32 %v724_v5, %v732_v27 }
 0x3e6   :  { %v2586_v23 = vmul.f32 %v2146_v28, %v2501_v57 }
 0x3e7   :  { %v745_v30 = vmul.f32 1.442695, %v740_v29 }
 0x3e8   :  { %1007 = vrot.lane.b32.xlu2 %v2586_v23, %s2229_s12  ;;  %872 = vrot.lane.b32.xlu1 %v2586_v23, %s2231_s14  ;;  %v816_v31 = vsel %vm279_vm2, %v2586_v23, 0.0 }
 0x3e9   :  { %2147 = vpow2.f32 %v745_v30  ;;  %817 = vadd.xlane.f32.xlu0 %v816_v31  ;;  %v1456_v31 = vsel %vm140_vm1, %v2545_v8, 0 }
 0x3ec   :  { %v735_v32 = vpop.xlane.xlu0 %734 }
 0x3ed   :  { %v741_v33 = vsub.f32 %v725_v14, %v735_v32 }
 0x3ef   :  { %v2148_v34 = vpop.eup %2147  ;;  %v747_v39 = vmul.f32 1.442695, %v741_v33 }
 0x3f0   :  { %v2595_v36 = vmul.f32 %v2148_v34, %v2501_v57  ;;  %1110 = vrot.lane.b32.xlu1 %v2586_v23, %s2230_s13 }
 0x3f1   :  { %2149 = vpow2.f32 %v747_v39 }
 0x3f2   :  { %1112 = vrot.lane.b32.xlu2 %v2595_v36, %s2230_s13  ;;  %v738_v63 = vpop.xlane.xlu1 %737  ;;  %v828_v35 = vpack.c.bf16 %v2595_v36, %v2586_v23 }
 0x3f3   :  { %v742_v40 = vsub.f32 %v726_v21, %v738_v63 }
 0x3f4   :  { %1997 = vmatmul.msk.bf16.vlgmr.msrb.gmra.mxu1 %vm279_vm2, %v828_v35 }
 0x3f5   :  { %v749_v45 = vmul.f32 1.442695, %v742_v40  ;;  %1259 = vmatpush.bf16.msrb.mxu1 %v1250_v41 }
 0x3f7   :  { %2151 = vpow2.f32 %v749_v45  ;;  %v2150_v57 = vpop.eup %2149 }
 0x3f8   :  { %v2613_v48 = vmul.f32 %v2150_v57, %v2494_v44 }
 0x3fa   :  { %1340 = vrot.lane.b32.xlu2 %v828_v35, %s2232_s15  ;;  %v822_v55 = vsel %vm279_vm2, %v2613_v48, 0.0 }
 0x3fd   :  { %v2152_v46 = vpop.eup %2151  ;;  %874 = vrot.lane.b32.xlu0 %v2595_v36, %s2231_s14 }
 0x3fe   :  { %v2610_v47 = vmul.f32 %v2152_v46, %v2494_v44  ;;  %v819_v44 = vsel %vm279_vm2, %v2595_v36, 0.0 }
 0x400   :  { %v2618_v4 = vpack.c.bf16 %v2610_v47, %v2613_v48  ;;  %v825_v5 = vsel %vm279_vm2, %v2610_v47, 0.0 }
 0x402   :  { %1546 = vrot.lane.b32.xlu2 %v828_v35, %s2234_s17 }
 0x404   :  { %1998 = vmatmul.msk.bf16.gmra.mxu1 %vm279_vm2, %v2618_v4 }
 0x405   :  { %1009 = vrot.lane.b32.xlu0 %v2595_v36, %s2229_s12 }
 0x40a   :  { %876 = vrot.lane.b32.xlu2 %v2613_v48, %s2231_s14 }
 0x40d   :  { %898 = vrot.lane.b32.xlu0 %v828_v35, %s2231_s14 }
 0x412   :  { %900 = vrot.lane.b32.xlu2 %v2618_v4, %s2231_s14 }
 0x415   :  { %1134 = vrot.lane.b32.xlu0 %v828_v35, %s2230_s13 }
 0x41a   :  { %820 = vadd.xlane.f32.xlu1 %v819_v44  ;;  %1011 = vrot.lane.b32.xlu2 %v2613_v48, %s2229_s12 }
 0x41d   :  { %878 = vrot.lane.b32.xlu0 %v2610_v47, %s2231_s14 }
 0x422   :  { %1013 = vrot.lane.b32.xlu2 %v2610_v47, %s2229_s12 }
 0x42a   :  { %977 = vrot.lane.b32.xlu2 %v976_v2, %s2228_s24 }
 0x432   :  { %1114 = vrot.lane.b32.xlu2 %v2613_v48, %s2230_s13 }
 0x433   :  { %1031 = vrot.lane.b32.xlu1 %v828_v35, %s2229_s12 }
 0x43a   :  { %1116 = vrot.lane.b32.xlu2 %v2610_v47, %s2230_s13 }
 0x43b   :  { %1237 = vrot.lane.b32.xlu1 %v828_v35, %s2233_s16 }
 0x442   :  { %1213 = vrot.lane.b32.xlu2 %v2586_v23, %s2233_s16  ;;  %v1008_v49 = vpop.permute.xlu2 %1007 }
 0x443   :  { %1443 = vrot.lane.b32.xlu1 %v828_v35, %s2235_s18  ;;  %v1019_v16 = vsel %vm279_vm2, %v1008_v49, 0.0 }
 0x447   :  { %823 = vadd.xlane.f32.xlu0 %v822_v55 }
 0x44a   :  { %1318 = vrot.lane.b32.xlu2 %v2595_v36, %s2232_s15 }
 0x44c   :  { %v1113_v52 = vpop.permute.xlu2 %1112 }
 0x44d   :  { %v1125_v25 = vsel %vm279_vm2, %v1113_v52, 0.0 }
 0x452   :  { %1076 = vrot.lane.b32.xlu2 %v1075_v53, %s2228_s24 }
 0x454   :  { %v2657_v54 = vpop.permute.xlu2 %1340 }
 0x45a   :  { %1320 = vrot.lane.b32.xlu2 %v2613_v48, %s2232_s15  ;;  %v873_v1 = vpop.permute.xlu1 %872 }
 0x45b   :  { %1215 = vrot.lane.b32.xlu0 %v2595_v36, %s2233_s16  ;;  %v884_v13 = vsel %vm279_vm2, %v873_v1, 0.0 }
 0x45c   :  { %v2663_v58 = vpop.permute.xlu2 %1546  ;;  %v818_v50 = vpop.xlane.xlu0 %817 }
 0x45d   :  { %2153 = vrcp.f32 %v818_v50 }
 0x462   :  { %1033 = vrot.lane.b32.xlu2 %v2618_v4, %s2229_s12  ;;  %v1111_v10 = vpop.permute.xlu1 %1110 }
 0x463   :  { %1217 = vrot.lane.b32.xlu0 %v2613_v48, %s2233_s16  ;;  %v2154_v17 = vpop.eup %2153  ;;  %v1122_v45 = vsel %vm279_vm2, %v1111_v10, 0.0  ;;  %v1281_v10 = vpack.c.b16 %v2349_v42, %v2349_v42 }
 0x464   :  { %v2669_v59 = vpop.permute.xlu2 %876 }
 0x46b   :  { %1179 = vrot.lane.b32.xlu0 %v1178_v60, %s2228_s24 }
 0x46c   :  { %v901_v56 = vpop.permute.xlu2 %900 }
 0x46d   :  { %826 = vadd.xlane.f32.xlu1 %v825_v5 }
 0x46f   :  { %v875_v61 = vpop.permute.xlu0 %874 }
 0x470   :  { %v887_v35 = vsel %vm279_vm2, %v875_v61, 0.0 }
 0x471   :  { %v848_v12 = vpop.f32.mrf.mxu1 }
 0x472   :  { %v862_v21 = vmul.f32 %v2154_v17, %v848_v12 }
 0x473   :  { %1322 = vrot.lane.b32.xlu0 %v2610_v47, %s2232_s15 }
 0x474   :  { %v1012_v62 = vpop.permute.xlu2 %1011 }
 0x475   :  { %v1025_v28 = vsel %vm279_vm2, %v1012_v62, 0.0 }
 0x477   :  { %v1010_v0 = vpop.permute.xlu0 %1009 }
 0x478   :  { %v1022_v41 = vsel %vm279_vm2, %v1010_v0, 0.0 }
 0x479   :  { %v850_v20 = vpop.f32.mrf.mxu1 }
 0x47b   :  { %1136 = vrot.lane.b32.xlu0 %v2618_v4, %s2230_s13 }
 0x47c   :  { %v2680_v6 = vpop.permute.xlu2 %1013 }
 0x47f   :  { %v899_v51 = vpop.permute.xlu0 %898 }
 0x480   :  { %1999 = vmatmul.msk.bf16.vlgmr.msrb.gmra.mxu3 %vm279_vm2, %v899_v51 }
 0x481   :  { %v853_v49 = vpop.f32.mrf.mxu1 }
 0x483   :  { %1239 = vrot.lane.b32.xlu0 %v2618_v4, %s2233_s16 }
 0x484   :  { %v978_v3 = vpop.permute.xlu2 %977 }
 0x485   :  { %v986_v11 = vsel %vm140_vm1, %v978_v3, 0 }
 0x486   :  { %1316 = vrot.lane.b32.xlu1 %v2586_v23, %s2232_s15  ;;  %995 = vmatpush.bf16.msrb.mxu2 %v986_v11 }
 0x487   :  { %v2703_v27 = vpop.permute.xlu0 %1134 }
 0x48b   :  { %1445 = vrot.lane.b32.xlu0 %v2618_v4, %s2235_s18  ;;  %885 = vadd.xlane.f32.xlu2 %v884_v13 }
 0x48c   :  { %v2691_v14 = vpop.permute.xlu2 %1114 }
 0x48d   :  { %v821_v15 = vpop.xlane.xlu1 %820  ;;  %v1128_v3 = vsel %vm279_vm2, %v2691_v14, 0.0 }
 0x48e   :  { %2155 = vrcp.f32 %v821_v15  ;;  %1219 = vrot.lane.b32.xlu1 %v2610_v47, %s2233_s16 }
 0x48f   :  { %v879_v32 = vpop.permute.xlu0 %878 }
 0x490   :  { %2000 = vmatmul.msk.bf16.gmra.mxu3 %vm279_vm2, %v901_v56  ;;  %v893_v33 = vsel %vm279_vm2, %v879_v32, 0.0  ;;  %v1353_v32 = vsel %vm140_vm1, %v2543_v7, 0 }
 0x493   :  { %1020 = vadd.xlane.f32.xlu2 %v1019_v16 }
 0x494   :  { %v2156_v19 = vpop.eup %2155  ;;  %v2697_v18 = vpop.permute.xlu2 %1116 }
 0x495   :  { %v863_v22 = vmul.f32 %v2156_v19, %v850_v20  ;;  %v1131_v20 = vsel %vm279_vm2, %v2697_v18, 0.0 }
 0x496   :  { %1342 = vrot.lane.b32.xlu1 %v2618_v4, %s2232_s15 }
 0x497   :  { %v866_v24 = vpack.c.bf16 %v863_v22, %v862_v21 }
 0x499   :  { %2003 = vmatmul.msk.bf16.vlgmr.msrb.gmra.mxu2 %vm279_vm2, %v866_v24 }
 0x49b   :  { %1126 = vadd.xlane.f32.xlu2 %v1125_v25 }
 0x49c   :  { %v1214_v26 = vpop.permute.xlu2 %1213 }
 0x49e   :  { %1548 = vrot.lane.b32.xlu1 %v2618_v4, %s2234_s17  ;;  %v890_v4 = vsel %vm279_vm2, %v2669_v59, 0.0  ;;  %v855_v59 = vpop.f32.mrf.mxu1 }
 0x4a3   :  { %1026 = vadd.xlane.f32.xlu2 %v1025_v28 }
 0x4a4   :  { %v2708_v29 = vpop.permute.xlu2 %1318 }
 0x4a5   :  { %v1032_v30 = vpop.permute.xlu1 %1031  ;;  %v1331_v14 = vsel %vm279_vm2, %v2708_v29, 0.0 }
 0x4a6   :  { %2005 = vmatmul.msk.bf16.vlgmr.msra.gmra.mxu1 %vm279_vm2, %v1032_v30 }
 0x4a7   :  { %1465 = vmatpush.bf16.msra.mxu1 %v1456_v31 }
 0x4ab   :  { %894 = vadd.xlane.f32.xlu2 %v893_v33 }
 0x4ac   :  { %v1077_v34 = vpop.permute.xlu2 %1076 }
 0x4ad   :  { %v1085_v39 = vsel %vm140_vm1, %v1077_v34, 0  ;;  %v1238_v57 = vpop.permute.xlu1 %1237 }
 0x4ae   :  { %1094 = vmatpush.bf16.msra.mxu3 %v1085_v39 }
 0x4b4   :  { %v2715_v63 = vpop.permute.xlu2 %1320 }
 0x4b5   :  { %888 = vadd.xlane.f32.xlu0 %v887_v35  ;;  %v1444_v2 = vpop.permute.xlu1 %1443 }
 0x4ba   :  { %v824_v8 = vpop.xlane.xlu0 %823 }
 0x4bb   :  { %2157 = vrcp.f32 %v824_v8 }
 0x4bc   :  { %v1034_v40 = vpop.permute.xlu2 %1033 }
 0x4bd   :  { %1023 = vadd.xlane.f32.xlu0 %v1022_v41  ;;  %2006 = vmatmul.msk.bf16.gmra.mxu1 %vm279_vm2, %v1034_v40 }
 0x4c1   :  { %v2158_v50 = vpop.eup %2157 }
 0x4c2   :  { %v864_v5 = vmul.f32 %v2158_v50, %v853_v49  ;;  %v1384_v50 = vpack.c.b16 %v2351_v43, %v2351_v43 }
 0x4c3   :  { %1522 = vrot.lane.b32.xlu2 %v2586_v23, %s2234_s17 }
 0x4c8   :  { %1123 = vadd.xlane.f32.xlu1 %v1122_v45 }
 0x4cd   :  { %v1216_v46 = vpop.permute.xlu0 %1215  ;;  %2013 = vmatmul.msk.bf16.vlgmr.msrb.gmra.mxu1 %vm279_vm2, %v1238_v57 }
 0x4ce   :  { %v1228_v0 = vsel %vm279_vm2, %v1216_v46, 0.0 }
 0x4d0   :  { %891 = vadd.xlane.f32.xlu1 %v890_v4 }
 0x4d1   :  { %1421 = vrot.lane.b32.xlu0 %v2595_v36, %s2235_s18 }
 0x4d5   :  { %v2728_v44 = vpop.permute.xlu0 %1217 }
 0x4dd   :  { %v1180_v55 = vpop.permute.xlu0 %1179 }
 0x4de   :  { %v1188_v52 = vsel %vm140_vm1, %v1180_v55, 0 }
 0x4df   :  { %1197 = vmatpush.bf16.msra.mxu2 %v1188_v52 }
 0x4e0   :  { %v827_v53 = vpop.xlane.xlu1 %826 }
 0x4e1   :  { %2159 = vrcp.f32 %v827_v53 }
 0x4e5   :  { %v2731_v60 = vpop.permute.xlu0 %1322 }
 0x4e7   :  { %v2160_v56 = vpop.eup %2159 }
 0x4e8   :  { %v865_v61 = vmul.f32 %v2160_v56, %v855_v59  ;;  %v1028_v56 = vsel %vm279_vm2, %v2680_v6, 0.0  ;;  %v1559_v59 = vsel %vm140_vm1, %v2547_v9, 0 }
 0x4e9   :  { %1419 = vrot.lane.b32.xlu1 %v2586_v23, %s2235_s18  ;;  %v1225_v23 = vsel %vm279_vm2, %v1214_v26, 0.0 }
 0x4ea   :  { %v867_v62 = vpack.c.bf16 %v865_v61, %v864_v5 }
 0x4ec   :  { %1229 = vadd.xlane.f32.xlu2 %v1228_v0  ;;  %2004 = vmatmul.msk.bf16.gmra.mxu2 %vm279_vm2, %v867_v62 }
 0x4ed   :  { %v2737_v1 = vpop.permute.xlu0 %1136 }
 0x4f5   :  { %v1240_v51 = vpop.permute.xlu0 %1239 }
 0x4f6   :  { %2014 = vmatmul.msk.bf16.gmra.mxu1 %vm279_vm2, %v1240_v51  ;;  %v1231_v51 = vsel %vm279_vm2, %v2728_v44, 0.0 }
 0x4f8   :  { %v1317_v11 = vpop.permute.xlu1 %1316 }
 0x4f9   :  { %v1328_v41 = vsel %vm279_vm2, %v1317_v11, 0.0 }
 0x4fb   :  { %1129 = vadd.xlane.f32.xlu0 %v1128_v3 }
 0x4fd   :  { %v1446_v12 = vpop.permute.xlu0 %1445 }
 0x4fe   :  { %v886_v13 = vpop.xlane.xlu2 %885 }
 0x4ff   :  { %2161 = vrcp.f32 %v886_v13 }
 0x500   :  { %v1220_v42 = vpop.permute.xlu1 %1219 }
 0x501   :  { %v1234_v61 = vsel %vm279_vm2, %v1220_v42, 0.0 }
 0x503   :  { %v925_v16 = vpop.f32.mrf.mxu3 }
 0x504   :  { %1282 = vrot.lane.b32.xlu2 %v1281_v10, %s2228_s24 }
 0x505   :  { %v2162_v21 = vpop.eup %2161 }
 0x506   :  { %2021 = vmatmul.msk.bf16.vlgmr.msra.gmra.mxu1 %vm279_vm2, %v1444_v2  ;;  %v1021_v15 = vpop.xlane.xlu2 %1020  ;;  %v939_v26 = vmul.f32 %v2162_v21, %v925_v16 }
 0x508   :  { %v2752_v19 = vpop.permute.xlu1 %1342 }
 0x50b   :  { %v927_v25 = vpop.f32.mrf.mxu3 }
 0x50f   :  { %1524 = vrot.lane.b32.xlu0 %v2595_v36, %s2234_s17  ;;  %v2754_v36 = vpop.xlane.xlu2 %1126 }
 0x510   :  { %v2758_v31 = vpop.permute.xlu1 %1548 }
 0x513   :  { %1226 = vadd.xlane.f32.xlu1 %v1225_v23  ;;  %v930_v57 = vpop.f32.mrf.mxu3  ;;  %v1337_v23 = vsel %vm279_vm2, %v2731_v60, 0.0 }
 0x516   :  { %2022 = vmatmul.msk.bf16.gmra.mxu1 %vm279_vm2, %v1446_v12 }
 0x517   :  { %v2765_v18 = vpop.xlane.xlu2 %1026 }
 0x51b   :  { %1332 = vadd.xlane.f32.xlu1 %v1331_v14  ;;  %v932_v49 = vpop.f32.mrf.mxu3 }
 0x51f   :  { %v895_v7 = vpop.xlane.xlu2 %894 }
 0x523   :  { %v1055_v22 = vpop.f32.mrf.mxu1 }
 0x528   :  { %v889_v17 = vpop.xlane.xlu0 %888 }
 0x529   :  { %2163 = vrcp.f32 %v889_v17 }
 0x52a   :  { %2165 = vrcp.f32 %v1021_v15 }
 0x52b   :  { %v1057_v39 = vpop.f32.mrf.mxu1 }
 0x52d   :  { %1132 = vadd.xlane.f32.xlu2 %v1131_v20 }
 0x52f   :  { %v2164_v24 = vpop.eup %2163 }
 0x530   :  { %v940_v28 = vmul.f32 %v2164_v24, %v927_v25  ;;  %v1024_v29 = vpop.xlane.xlu0 %1023  ;;  %v2166_v33 = vpop.eup %2165  ;;  %v2227_v25 = vld [vmem:[%s3029_s2 + $0x1] ss:$0 sm:$0xff] }
 0x531   :  { %2167 = vrcp.f32 %v1024_v29  ;;  %v1069_v35 = vmul.f32 %v2166_v33, %v1055_v22 }
 0x532   :  { %v943_v30 = vpack.c.bf16 %v940_v28, %v939_v26  ;;  %2169 = vrcp.f32 %v895_v7 }
 0x534   :  { %2001 = vmatmul.msk.bf16.vlgmr.msra.gmra.mxu0 %vm279_vm2, %v943_v30  ;;  %1425 = vrot.lane.b32.xlu1 %v2610_v47, %s2235_s18 }
 0x535   :  { %1362 = vmatpush.bf16.msra.mxu0 %v1353_v32 }
 0x537   :  { %v2168_v34 = vpop.eup %2167 }
 0x538   :  { %v1070_v40 = vmul.f32 %v2168_v34, %v1057_v39  ;;  %v2170_v4 = vpop.eup %2169 }
 0x539   :  { %1329 = vadd.xlane.f32.xlu0 %v1328_v41  ;;  %v942_v52 = vmul.f32 %v2170_v4, %v932_v49 }
 0x53a   :  { %v1073_v8 = vpack.c.bf16 %v1070_v40, %v1069_v35 }
 0x53b   :  { %v2768_v45 = vpop.xlane.xlu1 %1123 }
 0x53c   :  { %2007 = vmatmul.msk.bf16.vlgmr.msra.gmra.mxu3 %vm279_vm2, %v1073_v8 }
 0x543   :  { %v892_v46 = vpop.xlane.xlu1 %891  ;;  %v1422_v43 = vpop.permute.xlu0 %1421 }
 0x544   :  { %2171 = vrcp.f32 %v892_v46  ;;  %v1434_v44 = vsel %vm279_vm2, %v1422_v43, 0.0 }
 0x545   :  { %1526 = vrot.lane.b32.xlu2 %v2613_v48, %s2234_s17  ;;  %2173 = vrcp.f32 %v2765_v18 }
 0x54a   :  { %v2172_v2 = vpop.eup %2171 }
 0x54b   :  { %v941_v55 = vmul.f32 %v2172_v2, %v930_v57  ;;  %v2174_v33 = vpop.eup %2173 }
 0x54d   :  { %1423 = vrot.lane.b32.xlu0 %v2613_v48, %s2235_s18  ;;  %v944_v53 = vpack.c.bf16 %v942_v52, %v941_v55  ;;  %v1523_v48 = vpop.permute.xlu2 %1522 }
 0x54e   :  { %v1534_v10 = vsel %vm279_vm2, %v1523_v48, 0.0 }
 0x54f   :  { %2002 = vmatmul.msk.bf16.gmra.mxu0 %vm279_vm2, %v944_v53 }
 0x555   :  { %1385 = vrot.lane.b32.xlu0 %v1384_v50, %s2228_s24 }
 0x55b   :  { %v1420_v62 = vpop.permute.xlu1 %1419 }
 0x55c   :  { %v1431_v9 = vsel %vm279_vm2, %v1420_v62, 0.0 }
 0x55e   :  { %1029 = vadd.xlane.f32.xlu1 %v1028_v56 }
 0x55f   :  { %2009 = vmatmul.msk.bf16.vlgmr.msrb.gmra.mxu0 %vm279_vm2, %v2703_v27  ;;  %v2785_v5 = vpop.xlane.xlu2 %1229 }
 0x560   :  { %1568 = vmatpush.bf16.msrb.mxu0 %v1559_v59 }
 0x567   :  { %v1283_v6 = vpop.permute.xlu2 %1282 }
 0x568   :  { %v1291_v0 = vsel %vm140_vm1, %v1283_v6, 0 }
 0x569   :  { %1300 = vmatpush.bf16.msrb.mxu3 %v1291_v0 }
 0x56e   :  { %1235 = vadd.xlane.f32.xlu2 %v1234_v61  ;;  %v2794_v27 = vpop.xlane.xlu0 %1129 }
 0x56f   :  { %2010 = vmatmul.msk.bf16.gmra.mxu0 %vm279_vm2, %v2737_v1 }
 0x576   :  { %1432 = vadd.xlane.f32.xlu2 %v1431_v9 }
 0x577   :  { %1528 = vrot.lane.b32.xlu1 %v2610_v47, %s2234_s17  ;;  %v1590_v47 = vpack.c.b16 %v2339_v38, %v2339_v38  ;;  %v997_v38 = vpop.f32.mrf.mxu2 }
 0x57f   :  { %1232 = vadd.xlane.f32.xlu0 %v1231_v51  ;;  %2017 = vmatmul.msk.bf16.vlgmr.msra.gmra.mxu0 %vm279_vm2, %v2657_v54  ;;  %v1334_v54 = vsel %vm279_vm2, %v2715_v63, 0.0 }
 0x581   :  { %v1525_v1 = vpop.permute.xlu0 %1524 }
 0x582   :  { %v1537_v3 = vsel %vm279_vm2, %v1525_v1, 0.0 }
 0x583   :  { %1538 = vadd.xlane.f32.xlu2 %v1537_v3 }
 0x586   :  { %v1227_v60 = vpop.xlane.xlu1 %1226 }
 0x587   :  { %1535 = vadd.xlane.f32.xlu0 %v1534_v10 }
 0x58e   :  { %v2818_v13 = vpop.xlane.xlu1 %1332 }
 0x58f   :  { %1338 = vadd.xlane.f32.xlu0 %v1337_v23  ;;  %2018 = vmatmul.msk.bf16.gmra.mxu0 %vm279_vm2, %v2752_v19 }
 0x59f   :  { %2025 = vmatmul.msk.bf16.vlgmr.msrb.gmra.mxu0 %vm279_vm2, %v2663_v58  ;;  %v1487_v58 = vpack.c.b16 %v2337_v37, %v2337_v37  ;;  %v1060_v37 = vpop.f32.mrf.mxu1 }
 0x5a0   :  { %v1133_v17 = vpop.xlane.xlu2 %1132  ;;  %v1071_v39 = vmul.f32 %v2174_v33, %v1060_v37 }
 0x5a1   :  { %1335 = vadd.xlane.f32.xlu1 %v1334_v54 }
 0x5a3   :  { %1591 = vrot.lane.b32.xlu0 %v1590_v47, %s2228_s24 }
 0x5a6   :  { %v1426_v20 = vpop.permute.xlu1 %1425 }
 0x5a7   :  { %v1440_v22 = vsel %vm279_vm2, %v1426_v20, 0.0 }
 0x5a8   :  { %v1527_v28 = vpop.permute.xlu2 %1526 }
 0x5a9   :  { %1435 = vadd.xlane.f32.xlu1 %v1434_v44  ;;  %v1540_v29 = vsel %vm279_vm2, %v1527_v28, 0.0 }
 0x5ac   :  { %v2816_v11 = vpop.xlane.xlu0 %1329 }
 0x5af   :  { %2026 = vmatmul.msk.bf16.gmra.mxu0 %vm279_vm2, %v2758_v31  ;;  %v1062_v31 = vpop.f32.mrf.mxu1 }
 0x5b1   :  { %v966_v12 = vpop.f32.mrf.mxu0 }
 0x5b2   :  { %v998_v63 = vadd.f32 %v997_v38, %v966_v12 }
 0x5b7   :  { %v1261_v8 = vpop.f32.mrf.mxu1 }
 0x5b9   :  { %v2826_v19 = vpop.f32.mrf.mxu0 }
 0x5bf   :  { %v1096_v14 = vpop.f32.mrf.mxu3  ;;  %v1424_v42 = vpop.permute.xlu0 %1423 }
 0x5c0   :  { %v2822_v15 = vadd.f32 %v1096_v14, %v998_v63  ;;  %v1437_v16 = vsel %vm279_vm2, %v1424_v42, 0.0  ;;  %v1263_v55 = vpop.f32.mrf.mxu1 }
 0x5c1   :  { %1438 = vadd.xlane.f32.xlu2 %v1437_v16 }
 0x5c2   :  { %1488 = vrot.lane.b32.xlu1 %v1487_v58, %s2228_s24 }
 0x5c7   :  { %v1386_v21 = vpop.permute.xlu0 %1385 }
 0x5c8   :  { %v1394_v24 = vsel %vm140_vm1, %v1386_v21, 0 }
 0x5c9   :  { %1441 = vadd.xlane.f32.xlu2 %v1440_v22  ;;  %1403 = vmatpush.bf16.msrb.mxu2 %v1394_v24 }
 0x5ca   :  { %1626 = vrot.lane.b32.xlu1 %v2227_v25, %s2228_s24 }
 0x5cc   :  { %v2834_v26 = vpop.f32.mrf.mxu0 }
 0x5d1   :  { %1541 = vadd.xlane.f32.xlu2 %v1540_v29  ;;  %v1030_v30 = vpop.xlane.xlu1 %1029 }
 0x5d2   :  { %2175 = vrcp.f32 %v1030_v30 }
 0x5d3   :  { %2177 = vrcp.f32 %v2754_v36 }
 0x5d4   :  { %v2838_v32 = vpop.f32.mrf.mxu0  ;;  %2179 = vrcp.f32 %v2768_v45 }
 0x5d5   :  { %2181 = vrcp.f32 %v1227_v60 }
 0x5d6   :  { %2183 = vrcp.f32 %v2785_v5  ;;  %v1266_v5 = vpop.f32.mrf.mxu1 }
 0x5d7   :  { %2185 = vrcp.f32 %v2794_v27 }
 0x5d8   :  { %v2176_v34 = vpop.eup %2175  ;;  %2187 = vrcp.f32 %v1133_v17 }
 0x5d9   :  { %v1072_v35 = vmul.f32 %v2176_v34, %v1062_v31  ;;  %v2178_v18 = vpop.eup %2177 }
 0x5da   :  { %v2180_v7 = vpop.eup %2179 }
 0x5db   :  { %v1074_v40 = vpack.c.bf16 %v1072_v35, %v1071_v39  ;;  %v2182_v57 = vpop.eup %2181 }
 0x5dc   :  { %v1158_v41 = vpop.f32.mrf.mxu0  ;;  %v2184_v49 = vpop.eup %2183  ;;  %v1275_v52 = vmul.f32 %v2182_v57, %v1261_v8 }
 0x5dd   :  { %2008 = vmatmul.msk.bf16.gmra.mxu3 %vm279_vm2, %v1074_v40  ;;  %v1172_v4 = vmul.f32 %v2180_v7, %v1158_v41  ;;  %v1276_v36 = vmul.f32 %v2184_v49, %v1263_v55  ;;  %v2186_v43 = vpop.eup %2185 }
 0x5de   :  { %v2188_v62 = vpop.eup %2187  ;;  %v1268_v10 = vpop.f32.mrf.mxu1 }
 0x5df   :  { %v1279_v56 = vpack.c.bf16 %v1276_v36, %v1275_v52 }
 0x5e1   :  { %v1236_v48 = vpop.xlane.xlu2 %1235 }
 0x5e2   :  { %2189 = vrcp.f32 %v1236_v48 }
 0x5e4   :  { %v1160_v46 = vpop.f32.mrf.mxu0 }
 0x5e5   :  { %v1173_v2 = vmul.f32 %v2178_v18, %v1160_v46 }
 0x5e6   :  { %v1467_v31 = vpop.f32.mrf.mxu1 }
 0x5e7   :  { %v1176_v53 = vpack.c.bf16 %v1173_v2, %v1172_v4 }
 0x5e8   :  { %v2190_v51 = vpop.eup %2189 }
 0x5e9   :  { %2011 = vmatmul.msk.bf16.vlgmr.msra.gmra.mxu2 %vm279_vm2, %v1176_v53  ;;  %v1529_v45 = vpop.permute.xlu1 %1528  ;;  %v1278_v23 = vmul.f32 %v2190_v51, %v1268_v10  ;;  %v1433_v21 = vpop.xlane.xlu2 %1432 }
 0x5ea   :  { %v1543_v50 = vsel %vm279_vm2, %v1529_v45, 0.0 }
 0x5eb   :  { %1544 = vadd.xlane.f32.xlu0 %v1543_v50 }
 0x5ec   :  { %v1163_v59 = vpop.f32.mrf.mxu0 }
 0x5ed   :  { %2015 = vmatmul.msk.bf16.vlgmr.msrb.gmra.mxu3 %vm279_vm2, %v1279_v56  ;;  %v1174_v0 = vmul.f32 %v2186_v43, %v1163_v59  ;;  %v2861_v43 = vpop.f32.mrf.mxu3 }
 0x5ee   :  { %v1469_v18 = vpop.f32.mrf.mxu1 }
 0x5f2   :  { %v1233_v61 = vpop.xlane.xlu0 %1232 }
 0x5f3   :  { %2191 = vrcp.f32 %v1233_v61  ;;  %v2859_v61 = vpop.f32.mrf.mxu2 }
 0x5f4   :  { %v1165_v6 = vpop.f32.mrf.mxu0  ;;  %2193 = vrcp.f32 %v2818_v13 }
 0x5f5   :  { %v1175_v9 = vmul.f32 %v2188_v62, %v1165_v6  ;;  %2195 = vrcp.f32 %v2816_v11 }
 0x5f6   :  { %v1539_v30 = vpop.xlane.xlu2 %1538  ;;  %v1472_v53 = vpop.f32.mrf.mxu1 }
 0x5f7   :  { %v1177_v1 = vpack.c.bf16 %v1175_v9, %v1174_v0 }
 0x5f9   :  { %v2192_v3 = vpop.eup %2191  ;;  %2012 = vmatmul.msk.bf16.gmra.mxu2 %vm279_vm2, %v1177_v1 }
 0x5fa   :  { %v1277_v27 = vmul.f32 %v2192_v3, %v1266_v5  ;;  %v2194_v44 = vpop.eup %2193  ;;  %v1536_v60 = vpop.xlane.xlu0 %1535 }
 0x5fb   :  { %v2196_v12 = vpop.eup %2195  ;;  %v1002_v62 = vpop.f32.mrf.mxu2 }
 0x5fc   :  { %v1364_v47 = vpop.f32.mrf.mxu0  ;;  %v1280_v54 = vpack.c.bf16 %v1278_v23, %v1277_v27  ;;  %v1003_v51 = vadd.f32 %v1002_v62, %v2834_v26 }
 0x5fd   :  { %v1378_v58 = vmul.f32 %v2196_v12, %v1364_v47 }
 0x5fe   :  { %2016 = vmatmul.msk.bf16.gmra.mxu3 %vm279_vm2, %v1280_v54  ;;  %v1474_v56 = vpop.f32.mrf.mxu1 }
 0x602   :  { %v1339_v16 = vpop.xlane.xlu0 %1338 }
 0x603   :  { %2197 = vrcp.f32 %v1339_v16  ;;  %v1004_v27 = vpop.f32.mrf.mxu2 }
 0x604   :  { %v1366_v38 = vpop.f32.mrf.mxu0 }
 0x605   :  { %v1379_v63 = vmul.f32 %v2194_v44, %v1366_v38 }
 0x607   :  { %v1382_v14 = vpack.c.bf16 %v1379_v63, %v1378_v58 }
 0x609   :  { %2019 = vmatmul.msk.bf16.vlgmr.msrb.gmra.mxu2 %vm279_vm2, %v1382_v14  ;;  %v2198_v22 = vpop.eup %2197 }
 0x60c   :  { %v1369_v42 = vpop.f32.mrf.mxu0 }
 0x614   :  { %v1371_v17 = vpop.f32.mrf.mxu0  ;;  %v1336_v20 = vpop.xlane.xlu1 %1335 }
 0x615   :  { %2199 = vrcp.f32 %v1336_v20  ;;  %v1592_v13 = vpop.permute.xlu0 %1591  ;;  %v1381_v37 = vmul.f32 %v2198_v22, %v1371_v17 }
 0x616   :  { %v1600_v11 = vsel %vm140_vm1, %v1592_v13, 0  ;;  %2201 = vrcp.f32 %v1539_v30 }
 0x617   :  { %1609 = vmatpush.bf16.msra.mxu2 %v1600_v11  ;;  %2203 = vrcp.f32 %v1536_v60  ;;  %v1005_v60 = vadd.f32 %v1004_v27, %v2838_v32 }
 0x61b   :  { %v2200_v24 = vpop.eup %2199 }
 0x61c   :  { %v1380_v25 = vmul.f32 %v2200_v24, %v1369_v42  ;;  %v1570_v28 = vpop.f32.mrf.mxu0  ;;  %v1436_v34 = vpop.xlane.xlu1 %1435 }
 0x61d   :  { %v2202_v39 = vpop.eup %2201  ;;  %2205 = vrcp.f32 %v1436_v34  ;;  %v2110_v34 = vld [vmem:[%s3027_s1 + $0x80] sm:$0xf] }
 0x61e   :  { %v1383_v29 = vpack.c.bf16 %v1381_v37, %v1380_v25  ;;  %v2204_v40 = vpop.eup %2203  ;;  %2207 = vrcp.f32 %v1433_v21  ;;  %v2055_v37 = vld [vmem:[%s3027_s1 + $0xb4] sm:$0xf]  ;;  %v2112_v25 = vld [vmem:[%s3027_s1 + $0xb8] sm:$0xf] }
 0x61f   :  { %v1584_v41 = vmul.f32 %v2204_v40, %v1570_v28 }
 0x620   :  { %2020 = vmatmul.msk.bf16.gmra.mxu2 %vm279_vm2, %v1383_v29  ;;  %v2057_v29 = vld [vmem:[%s3027_s1 + $0xd0] sm:$0xf0] }
 0x621   :  { %v2060_v30 = vor.u32 %v2112_v25, %v2057_v29 }
 0x623   :  { %v2206_v7 = vpop.eup %2205 }
 0x624   :  { %v1572_v33 = vpop.f32.mrf.mxu0  ;;  %v2208_v57 = vpop.eup %2207  ;;  %v1482_v46 = vmul.f32 %v2206_v7, %v1469_v18  ;;  %v2039_v18 = vld [vmem:[%s3027_s1 + $0x44] sm:$0xf]  ;;  %v2109_v7 = vld [vmem:[%s3027_s1 + $0x5c] sm:$0xf0] }
 0x625   :  { %v1585_v35 = vmul.f32 %v2202_v39, %v1572_v33  ;;  %v1481_v49 = vmul.f32 %v2208_v57, %v1467_v31  ;;  %v2047_v31 = vld [vmem:[%s3027_s1 + $0x7c] sm:$0xf]  ;;  %v2111_v33 = vld [vmem:[%s3027_s1 + $0x94] sm:$0xf0]  ;;  %v2108_v57 = vld [vmem:[%s3027_s1 + $0x48] sm:$0xf] }
 0x626   :  { %v2048_v39 = vor.u32 %v2111_v33, %v2047_v31 }
 0x627   :  { %v1588_v8 = vpack.c.bf16 %v1585_v35, %v1584_v41  ;;  %v1485_v52 = vpack.c.bf16 %v1482_v46, %v1481_v49  ;;  %v2049_v35 = vld [vmem:[%s3027_s1 + $0x98] sm:$0xf0]  ;;  %v2040_v46 = vor.u32 %v2109_v7, %v2039_v18  ;;  %v2031_v49 = vld [vmem:[%s3027_s1 + $0xc] sm:$0xf]  ;;  %v2067_v18 = vld [vmem:[%s3027_s1 + $0x14] sm:$0xf] }
 0x628   :  { %v2052_v40 = vor.u32 %v2110_v34, %v2049_v35  ;;  %v2115_v7 = vld [vmem:[%s3027_s1 + $0x2c] sm:$0xf0] }
 0x62c   :  { %v1575_v0 = vpop.f32.mrf.mxu0 }
 0x630   :  { %2027 = vmatmul.msk.bf16.vlgmr.msra.gmra.mxu2 %vm279_vm2, %v1588_v8 }
 0x634   :  { %v1439_v4 = vpop.xlane.xlu2 %1438  ;;  %v1489_v2 = vpop.permute.xlu1 %1488 }
 0x635   :  { %v1497_v55 = vsel %vm140_vm1, %v1489_v2, 0  ;;  %2209 = vrcp.f32 %v1439_v4  ;;  %v1577_v47 = vpop.f32.mrf.mxu0  ;;  %v2041_v4 = vld [vmem:[%s3027_s1 + $0x60] sm:$0xf0] }
 0x636   :  { %1506 = vmatpush.bf16.msra.mxu3 %v1497_v55  ;;  %v2044_v2 = vor.u32 %v2108_v57, %v2041_v4  ;;  %v2107_v55 = vld [vmem:[%s3027_s1 + $0x24] sm:$0xf0]  ;;  %v2068_v57 = vor.u32 %v2115_v7, %v2067_v18  ;;  %v2069_v4 = vld [vmem:[%s3027_s1 + $0x30] sm:$0xf0]  ;;  %v2245_v18 = vmov 64.0  }
 0x639   :  { %2023 = vmatmul.msk.bf16.vlgmr.msra.gmra.mxu3 %vm279_vm2, %v1485_v52  ;;  %v2106_v52 = vld [vmem:[%s3027_s1 + $0x10] sm:$0xf] }
 0x63a   :  { %1709 = vmatpush.bf16.msrb.mxu3 %v2060_v30 }
 0x63b   :  { %v2210_v45 = vpop.eup %2209 }
 0x63c   :  { %v1442_v36 = vpop.xlane.xlu2 %1441  ;;  %v1483_v59 = vmul.f32 %v2210_v45, %v1472_v53  ;;  %v2032_v53 = vor.u32 %v2107_v55, %v2031_v49  ;;  %v1942_v49 = vld [vmem:[%s3029_s2 + $0x3] ss:$8 sm:$0x3] }
 0x63d   :  { %2211 = vrcp.f32 %v1442_v36  ;;  %v2033_v36 = vld [vmem:[%s3027_s1 + $0x28] sm:$0xf0] }
 0x63e   :  { %1710 = vmatpush.bf16.msrb.mxu3 %v2052_v40  ;;  %v2036_v45 = vor.u32 %v2106_v52, %v2033_v36  ;;  %v2116_v40 = vld [vmem:[%s3027_s1 + $0x50] sm:$0xf]  ;;  %v1636_v52 = vperm.slane %v1942_v49, 0 }
 0x642   :  { %1711 = vmatpush.bf16.msrb.mxu3 %v2044_v2 }
 0x643   :  { %v2212_v50 = vpop.eup %2211 }
 0x644   :  { %v1484_v48 = vmul.f32 %v2212_v50, %v1474_v56  ;;  %v1542_v6 = vpop.xlane.xlu2 %1541 }
 0x645   :  { %2213 = vrcp.f32 %v1542_v6 }
 0x646   :  { %v1486_v5 = vpack.c.bf16 %v1484_v48, %v1483_v59  ;;  %1712 = vmatpush.bf16.msrb.mxu3 %v2036_v45  ;;  %v1000_v59 = vadd.f32 %v2859_v61, %v2826_v19  ;;  %v2091_v61 = vld [vmem:[%s3027_s1 + $0xbc] sm:$0xf] }
 0x648   :  { %v1107_v62 = vadd.f32 %v2861_v43, %v1000_v59  ;;  %v2121_v43 = vld [vmem:[%s3027_s1 + $0xd4] sm:$0xf0] }
 0x649   :  { %2024 = vmatmul.msk.bf16.gmra.mxu3 %vm279_vm2, %v1486_v5 }
 0x64b   :  { %v2214_v10 = vpop.eup %2213 }
 0x64c   :  { %v1586_v54 = vmul.f32 %v2214_v10, %v1575_v0 }
 0x65e   :  { %v1545_v9 = vpop.xlane.xlu0 %1544 }
 0x65f   :  { %2215 = vrcp.f32 %v1545_v9 }
 0x660   :  { %v1101_v1 = vpop.f32.mrf.mxu3  ;;  %2217 = vrcp.f32 %v2245_v18 }
 0x661   :  { %v1108_v3 = vadd.f32 %v1101_v1, %v1003_v51 }
 0x665   :  { %v2216_v23 = vpop.eup %2215 }
 0x666   :  { %v1587_v44 = vmul.f32 %v2216_v23, %v1577_v47  ;;  %v2218_v7 = vpop.eup %2217 }
 0x667   :  { %vm1835_vm10 = vweird.f32 %v2218_v7 }
 0x668   :  { %v1103_v12 = vpop.f32.mrf.mxu3  ;;  %v1589_v38 = vpack.c.bf16 %v1587_v44, %v1586_v54  ;;  %v1627_v54 = vpop.permute.xlu1 %1626 }
 0x669   :  { %v1109_v58 = vadd.f32 %v1103_v12, %v1005_v60 }
 0x66a   :  { %2028 = vmatmul.msk.bf16.gmra.mxu2 %vm279_vm2, %v1589_v38  ;;  %v2120_v38 = vld [vmem:[%s3027_s1 + $0xc0] sm:$0xf] }
 0x66c   :  { %v1199_v63 = vpop.f32.mrf.mxu2 }
 0x66d   :  { %v1209_v14 = vadd.f32 %v1199_v63, %v2822_v15  ;;  %v2113_v15 = vld [vmem:[%s3027_s1 + $0xcc] sm:$0xf0]  ;;  %v2093_v63 = vld [vmem:[%s3027_s1 + $0xd8] sm:$0xf0] }
 0x66e   :  { %v2056_v28 = vor.u32 %v2113_v15, %v2055_v37 }
 0x670   :  { %v1302_v26 = vpop.f32.mrf.mxu3  ;;  %1690 = vmatpush.bf16.msrb.mxu1 %v2056_v28 }
 0x671   :  { %v1312_v6 = vadd.f32 %v1302_v26, %v1209_v14  ;;  %v2096_v14 = vor.u32 %v2120_v38, %v2093_v63  ;;  %v2083_v26 = vld [vmem:[%s3027_s1 + $0x84] sm:$0xf] }
 0x673   :  { %1799 = vmatpush.bf16.xpose.msrb.mxu2 %v2096_v14 }
 0x674   :  { %v1201_v42 = vpop.f32.mrf.mxu2  ;;  %1691 = vmatpush.bf16.msrb.mxu1 %v2048_v39  ;;  %v2117_v39 = vld [vmem:[%s3027_s1 + $0x64] sm:$0xf0] }
 0x675   :  { %v1210_v0 = vadd.f32 %v1201_v42, %v1107_v62  ;;  %v2119_v42 = vld [vmem:[%s3027_s1 + $0x9c] sm:$0xf0] }
 0x678   :  { %v1304_v16 = vpop.f32.mrf.mxu3  ;;  %1692 = vmatpush.bf16.msrb.mxu1 %v2040_v46  ;;  %v2114_v46 = vld [vmem:[%s3027_s1 + $0x18] sm:$0xf] }
 0x679   :  { %v1313_v51 = vadd.f32 %v1304_v16, %v1210_v0  ;;  %v2118_v16 = vld [vmem:[%s3027_s1 + $0x88] sm:$0xf]  ;;  %v2072_v2 = vor.u32 %v2114_v46, %v2069_v4 }
 0x67c   :  { %v1204_v17 = vpop.f32.mrf.mxu2  ;;  %1693 = vmatpush.bf16.msrb.mxu1 %v2032_v53 }
 0x67d   :  { %v1211_v20 = vadd.f32 %v1204_v17, %v1108_v3  ;;  %v2085_v17 = vld [vmem:[%s3027_s1 + $0xa0] sm:$0xf0] }
 0x681   :  { %v1307_v13 = vpop.f32.mrf.mxu3 }
 0x682   :  { %v1314_v11 = vadd.f32 %v1307_v13, %v1211_v20  ;;  %v2084_v20 = vor.u32 %v2119_v42, %v2083_v26  ;;  %v2088_v13 = vor.u32 %v2118_v16, %v2085_v17 }
 0x684   :  { %v1206_v21 = vpop.f32.mrf.mxu2  ;;  %1800 = vmatpush.bf16.xpose.msrb.mxu2 %v2088_v13 }
 0x685   :  { %v2867_v22 = vadd.f32 %v1206_v21, %v1109_v58  ;;  %v2092_v58 = vor.u32 %v2121_v43, %v2091_v61 }
 0x687   :  { %1780 = vmatpush.bf16.xpose.msra.mxu0 %v2092_v58 }
 0x689   :  { %v1309_v56 = vpop.f32.mrf.mxu3 }
 0x68c   :  { %v1405_v24 = vpop.f32.mrf.mxu2 }
 0x68d   :  { %v1415_v9 = vadd.f32 %v1405_v24, %v1312_v6  ;;  %v1315_v24 = vadd.f32 %v1309_v56, %v2867_v22  ;;  %v2075_v22 = vld [vmem:[%s3027_s1 + $0x4c] sm:$0xf] }
 0x68e   :  { %v2076_v35 = vor.u32 %v2117_v39, %v2075_v22 }
 0x68f   :  { %1781 = vmatpush.bf16.xpose.msra.mxu0 %v2084_v20 }
 0x694   :  { %v1407_v32 = vpop.f32.mrf.mxu2 }
 0x695   :  { %v1416_v3 = vadd.f32 %v1407_v32, %v1313_v51 }
 0x697   :  { %1782 = vmatpush.bf16.xpose.msra.mxu0 %v2076_v35 }
 0x69f   :  { %1783 = vmatpush.bf16.xpose.msra.mxu0 %v2068_v57  ;;  %v1831_v57 = vmul.f32 64.0, %v2218_v7 }
 0x6a1   :  { %v1832_v46 = vsub.f32 1.0, %v1831_v57 }
 0x6a3   :  { %v1410_v41 = vpop.f32.mrf.mxu2  ;;  %v1833_v4 = vmul.f32 %v2218_v7, %v1832_v46 }
 0x6a4   :  { %v1417_v8 = vadd.f32 %v1410_v41, %v1314_v11  ;;  %v2077_v41 = vld [vmem:[%s3027_s1 + $0x68] sm:$0xf0] }
 0x6ab   :  { %v1412_v50 = vpop.f32.mrf.mxu2 }
 0x6ac   :  { %v1418_v37 = vadd.f32 %v1412_v50, %v1315_v24  ;;  %v1637_v50 = vperm.slane %v1942_v49, 1 }
 0x6b3   :  { %v1611_v48 = vpop.f32.mrf.mxu2 }
 0x6bb   :  { %v1613_v47 = vpop.f32.mrf.mxu2 }
 0x6bc   :  { %v1508_v5 = vpop.f32.mrf.mxu3 }
 0x6bd   :  { %v1518_v1 = vadd.f32 %v1508_v5, %v1415_v9 }
 0x6bf   :  { %v1621_v27 = vadd.f32 %v1611_v48, %v1518_v1 }
 0x6c1   :  { %v2920_v60 = vadd.f32 %v1627_v54, %v1621_v27 }
 0x6c4   :  { %v1510_v10 = vpop.f32.mrf.mxu3 }
 0x6c5   :  { %v1519_v23 = vadd.f32 %v1510_v10, %v1416_v3  ;;  %v58_v3 = vld [vmem:[%s3029_s2 + $0x9] ss:$0 sm:$0xff] }
 0x6c6   :  { %1914 = vrot.lane.b32.xlu0 %v58_v3, %s2228_s24 }
 0x6c7   :  { %v1622_v44 = vadd.f32 %v1613_v47, %v1519_v23 }
 0x6c9   :  { %v2922_v12 = vadd.f32 %v1627_v54, %v1622_v44 }
 0x6cb   :  { %v1633_v19 = vpack.c.bf16 %v2922_v12, %v2920_v60 }
 0x6cc   :  { %v1513_v11 = vpop.f32.mrf.mxu3 }
 0x6cd   :  { %2061 = vmatmul.msk.bf16.vlgmr.msrb.gmra.mxu1 %vm88_vm0, %v1633_v19  ;;  %2063 = vmatmul.msk.bf16.vlgmr.msrb.gmra.mxu3 %vm88_vm0, %v1633_v19  ;;  %v1520_v15 = vadd.f32 %v1513_v11, %v1417_v8  ;;  %v2080_v8 = vor.u32 %v2116_v40, %v2077_v41 }
 0x6cf   :  { %1801 = vmatpush.bf16.xpose.msrb.mxu2 %v2080_v8 }
 0x6d4   :  { %v1515_v32 = vpop.f32.mrf.mxu3 }
 0x6d5   :  { %v1521_v25 = vadd.f32 %v1515_v32, %v1418_v37 }
 0x6d7   :  { %1802 = vmatpush.bf16.xpose.msrb.mxu2 %v2072_v2  ;;  %v1834_v2 = vadd.f32 %v2218_v7, %v1833_v4 }
 0x6ed   :  { %v1616_v21 = vpop.f32.mrf.mxu2 }
 0x6ee   :  { %v1623_v28 = vadd.f32 %v1616_v21, %v1520_v15 }
 0x6f0   :  { %v2953_v31 = vadd.f32 %v1627_v54, %v1623_v28 }
 0x6f5   :  { %v1618_v29 = vpop.f32.mrf.mxu2 }
 0x6f6   :  { %v1624_v30 = vadd.f32 %v1618_v29, %v1521_v25 }
 0x6f8   :  { %v2955_v33 = vadd.f32 %v1627_v54, %v1624_v30 }
 0x6fa   :  { %v1634_v34 = vpack.c.bf16 %v2955_v33, %v2953_v31 }
 0x6fc   :  { %2062 = vmatmul.msk.bf16.gmra.mxu1 %vm88_vm0, %v1634_v34  ;;  %2064 = vmatmul.msk.bf16.gmra.mxu3 %vm88_vm0, %v1634_v34 }
 0x74a   :  { %v1695_v55 = vpop.f32.mrf.mxu1 }
 0x74b   :  { %v1696_v36 = vadd.f32 %v1695_v55, %v1636_v52 }
 0x74d   :  { %v1724_v59 = vmax.f32 %v1696_v36, 0.0 }
 0x750   :  { %v1714_v53 = vpop.f32.mrf.mxu3 }
 0x751   :  { %v1715_v5 = vadd.f32 %v1714_v53, %v1637_v50 }
 0x752   :  { %v1697_v45 = vpop.f32.mrf.mxu1 }
 0x753   :  { %v1698_v56 = vadd.f32 %v1697_v45, %v1636_v52  ;;  %v1725_v9 = vmax.f32 %v1715_v5, 0.0 }
 0x755   :  { %v1726_v48 = vmax.f32 %v1698_v56, 0.0 }
 0x757   :  { %v1732_v62 = vpack.c.bf16 %v1726_v48, %v1724_v59 }
 0x758   :  { %v1716_v6 = vpop.f32.mrf.mxu3 }
 0x759   :  { %v1717_v0 = vadd.f32 %v1716_v6, %v1637_v50  ;;  %1784 = vmatmul.bf16.vlgmr.msra.gmra.mxu0 %v1732_v62 }
 0x75b   :  { %v1727_v51 = vmax.f32 %v1717_v0, 0.0 }
 0x75d   :  { %v1733_v1 = vpack.c.bf16 %v1727_v51, %v1725_v9 }
 0x75f   :  { %1803 = vmatmul.bf16.vlgmr.msrb.gmra.mxu2 %v1733_v1 }
 0x779   :  { %v1700_v10 = vpop.f32.mrf.mxu1 }
 0x77a   :  { %v1701_v23 = vadd.f32 %v1700_v10, %v1636_v52 }
 0x77c   :  { %v1728_v44 = vmax.f32 %v1701_v23, 0.0 }
 0x77f   :  { %v1719_v27 = vpop.f32.mrf.mxu3 }
 0x780   :  { %v1720_v61 = vadd.f32 %v1719_v27, %v1637_v50 }
 0x781   :  { %v1702_v47 = vpop.f32.mrf.mxu1 }
 0x782   :  { %v1703_v54 = vadd.f32 %v1702_v47, %v1636_v52  ;;  %v1729_v63 = vmax.f32 %v1720_v61, 0.0 }
 0x784   :  { %v1730_v19 = vmax.f32 %v1703_v54, 0.0 }
 0x786   :  { %v1734_v43 = vpack.c.bf16 %v1730_v19, %v1728_v44 }
 0x787   :  { %v1721_v38 = vpop.f32.mrf.mxu3 }
 0x788   :  { %v1722_v58 = vadd.f32 %v1721_v38, %v1637_v50  ;;  %1789 = vmatmul.bf16.gmra.mxu0 %v1734_v43 }
 0x78a   :  { %v1731_v14 = vmax.f32 %v1722_v58, 0.0  ;;  %v1915_v58 = vpop.permute.xlu0 %1914 }
 0x78c   :  { %v1735_v26 = vpack.c.bf16 %v1731_v14, %v1729_v63 }
 0x78e   :  { %1808 = vmatmul.bf16.gmra.mxu2 %v1735_v26  ;;  %v59_v26 = vld [vmem:[%s3029_s2 + $0x2] ss:$0 sm:$0xff] }
 0x7d6   :  { %v1785_v42 = vpop.f32.mrf.mxu0 }
 0x7d7   :  { %v1786_v21 = vadd.f32 %v1785_v42, %v58_v3 }
 0x7de   :  { %v1787_v17 = vpop.f32.mrf.mxu0 }
 0x7df   :  { %v1788_v20 = vadd.f32 %v1787_v17, %v58_v3 }
 0x7e2   :  { %v1804_v16 = vpop.f32.mrf.mxu2 }
 0x7e3   :  { %v1805_v32 = vadd.f32 %v1804_v16, %v1786_v21 }
 0x7e5   :  { %v1814_v15 = vadd.f32 %v1805_v32, %v2920_v60 }
 0x7e7   :  { %v1818_v25 = vsel %vm88_vm0, %v1814_v15, 0.0 }
 0x7ea   :  { %v1806_v13 = vpop.f32.mrf.mxu2 }
 0x7eb   :  { %v1807_v11 = vadd.f32 %v1806_v13, %v1788_v20 }
 0x7ed   :  { %v1815_v24 = vadd.f32 %v1807_v11, %v2922_v12 }
 0x7ef   :  { %v1821_v37 = vsel %vm88_vm0, %v1815_v24, 0.0 }
 0x7f0   :  { %1822 = vadd.xlane.f32.xlu2 %v1821_v37 }
 0x7f8   :  { %1819 = vadd.xlane.f32.xlu2 %v1818_v25 }
 0x805   :  { %v1790_v28 = vpop.f32.mrf.mxu0 }
 0x806   :  { %v1791_v29 = vadd.f32 %v1790_v28, %v58_v3 }
 0x80d   :  { %v1792_v39 = vpop.f32.mrf.mxu0 }
 0x80e   :  { %v1793_v12 = vadd.f32 %v1792_v39, %v58_v3 }
 0x811   :  { %v1809_v30 = vpop.f32.mrf.mxu2 }
 0x812   :  { %v1810_v34 = vadd.f32 %v1809_v30, %v1791_v29 }
 0x814   :  { %v1816_v22 = vadd.f32 %v1810_v34, %v2953_v31  ;;  %v1836_v31 = vsel %vm1835_vm10, %v2218_v7, %v1834_v2 }
 0x816   :  { %v1824_v35 = vsel %vm88_vm0, %v1816_v22, 0.0 }
 0x817   :  { %1825 = vadd.xlane.f32.xlu2 %v1824_v35 }
 0x819   :  { %v1811_v40 = vpop.f32.mrf.mxu2 }
 0x81a   :  { %v1812_v41 = vadd.f32 %v1811_v40, %v1793_v12 }
 0x81c   :  { %v1817_v8 = vadd.f32 %v1812_v41, %v2955_v33 }
 0x81e   :  { %v1827_v60 = vsel %vm88_vm0, %v1817_v8, 0.0 }
 0x81f   :  { %1828 = vadd.xlane.f32.xlu1 %v1827_v60 }
 0x863   :  { %v1823_v49 = vpop.xlane.xlu2 %1822 }
 0x864   :  { %v1838_v55 = vmul.f32 %v1836_v31, %v1823_v49 }
 0x866   :  { %v1842_v52 = vsub.f32 %v1815_v24, %v1838_v55 }
 0x868   :  { %v1846_v53 = vmul.f32 %v1842_v52, %v1842_v52 }
 0x86a   :  { %v1852_v36 = vsel %vm88_vm0, %v1846_v53, 0.0 }
 0x86b   :  { %1853 = vadd.xlane.f32.xlu2 %v1852_v36  ;;  %v1820_v33 = vpop.xlane.xlu2 %1819 }
 0x86c   :  { %v1837_v56 = vmul.f32 %v1836_v31, %v1820_v33 }
 0x86e   :  { %v3001_v5 = vsub.f32 %v1814_v15, %v1837_v56 }
 0x870   :  { %v1845_v9 = vmul.f32 %v3001_v5, %v3001_v5 }
 0x872   :  { %v1849_v1 = vsel %vm88_vm0, %v1845_v9, 0.0 }
 0x88a   :  { %v1826_v6 = vpop.xlane.xlu2 %1825 }
 0x88b   :  { %v1839_v0 = vmul.f32 %v1836_v31, %v1826_v6 }
 0x88d   :  { %v3006_v51 = vsub.f32 %v1816_v22, %v1839_v0 }
 0x88f   :  { %v1847_v3 = vmul.f32 %v3006_v51, %v3006_v51 }
 0x891   :  { %v1855_v10 = vsel %vm88_vm0, %v1847_v3, 0.0 }
 0x892   :  { %v1829_v45 = vpop.xlane.xlu1 %1828 }
 0x893   :  { %v1840_v50 = vmul.f32 %v1836_v31, %v1829_v45 }
 0x895   :  { %v1844_v59 = vsub.f32 %v1817_v8, %v1840_v50 }
 0x897   :  { %v1848_v48 = vmul.f32 %v1844_v59, %v1844_v59 }
 0x899   :  { %v1858_v62 = vsel %vm88_vm0, %v1848_v48, 0.0 }
 0x89a   :  { %1859 = vadd.xlane.f32.xlu2 %v1858_v62 }
 0x8a2   :  { %1850 = vadd.xlane.f32.xlu2 %v1849_v1 }
 0x8aa   :  { %1856 = vadd.xlane.f32.xlu2 %v1855_v10 }
 0x8de   :  { %v1854_v27 = vpop.xlane.xlu2 %1853 }
 0x8df   :  { %v1862_v23 = vmul.f32 %v1854_v27, %v1836_v31 }
 0x8e1   :  { %v1866_v47 = vadd.f32 1e-05, %v1862_v23 }
 0x8e3   :  { %2219 = vrsqrt.f32 %v1866_v47  ;;  %vm1885_vm12 = vweird.f32 %v1866_v47 }
 0x8e9   :  { %v2220_v54 = vpop.eup %2219 }
 0x8ea   :  { %v1880_v44 = vmul.f32 %v2220_v54, %v1866_v47  ;;  %vm1886_vm11 = vweird.f32 %v2220_v54 }
 0x8eb   :  { %vm1887_vm13 = vmor %vm1885_vm12, %vm1886_vm11 }
 0x8ec   :  { %v1881_v19 = vmul.f32 %v2220_v54, %v1880_v44 }
 0x8ee   :  { %v1882_v61 = vmul.f32 0.5, %v1881_v19 }
 0x8f0   :  { %v1883_v43 = vsub.f32 1.5, %v1882_v61 }
 0x8f2   :  { %v1884_v38 = vmul.f32 %v2220_v54, %v1883_v43 }
 0x8f4   :  { %v1888_v63 = vsel %vm1887_vm13, %v2220_v54, %v1884_v38 }
 0x8f5   :  { %v1910_v14 = vmul.f32 %v1888_v63, %v1842_v52 }
 0x8f7   :  { %v1918_v42 = vmul.f32 %v1915_v58, %v1910_v14 }
 0x8f9   :  { %v1922_v16 = vadd.f32 %v1918_v42, %v59_v26 }
 0x8fb   :  { %1926 = vrot.lane.b32.xlu1 %v1922_v16, %s2228_s24 }
 0x90d   :  { %v1860_v17 = vpop.xlane.xlu2 %1859 }
 0x90e   :  { %v1864_v20 = vmul.f32 %v1860_v17, %v1836_v31 }
 0x910   :  { %v1868_v13 = vadd.f32 1e-05, %v1864_v20 }
 0x912   :  { %2221 = vrsqrt.f32 %v1868_v13  ;;  %vm1905_vm15 = vweird.f32 %v1868_v13 }
 0x915   :  { %v1851_v11 = vpop.xlane.xlu2 %1850 }
 0x916   :  { %v1861_v21 = vmul.f32 %v1851_v11, %v1836_v31 }
 0x918   :  { %v2222_v24 = vpop.eup %2221  ;;  %v1865_v32 = vadd.f32 1e-05, %v1861_v21 }
 0x919   :  { %v1900_v37 = vmul.f32 %v2222_v24, %v1868_v13  ;;  %vm1906_vm14 = vweird.f32 %v2222_v24 }
 0x91a   :  { %2223 = vrsqrt.f32 %v1865_v32  ;;  %vm1907_vm1 = vmor %vm1905_vm15, %vm1906_vm14  ;;  %vm1875_vm3 = vweird.f32 %v1865_v32 }
 0x91b   :  { %v1901_v15 = vmul.f32 %v2222_v24, %v1900_v37 }
 0x91d   :  { %v1902_v25 = vmul.f32 0.5, %v1901_v15  ;;  %v1857_v28 = vpop.xlane.xlu2 %1856 }
 0x91e   :  { %v1863_v29 = vmul.f32 %v1857_v28, %v1836_v31 }
 0x91f   :  { %v1903_v30 = vsub.f32 1.5, %v1902_v25 }
 0x920   :  { %v2224_v34 = vpop.eup %2223  ;;  %v1867_v22 = vadd.f32 1e-05, %v1863_v29 }
 0x921   :  { %v1904_v39 = vmul.f32 %v2222_v24, %v1903_v30  ;;  %v1870_v35 = vmul.f32 %v2224_v34, %v1865_v32  ;;  %vm1876_vm2 = vweird.f32 %v2224_v34 }
 0x922   :  { %2225 = vrsqrt.f32 %v1867_v22  ;;  %vm1877_vm4 = vmor %vm1875_vm3, %vm1876_vm2  ;;  %vm1895_vm6 = vweird.f32 %v1867_v22 }
 0x923   :  { %v1908_v12 = vsel %vm1907_vm1, %v2222_v24, %v1904_v39  ;;  %v1871_v40 = vmul.f32 %v2224_v34, %v1870_v35 }
 0x924   :  { %v1912_v41 = vmul.f32 %v1908_v12, %v1844_v59 }
 0x925   :  { %v1872_v8 = vmul.f32 0.5, %v1871_v40 }
 0x926   :  { %v1920_v60 = vmul.f32 %v1915_v58, %v1912_v41 }
 0x927   :  { %v1873_v18 = vsub.f32 1.5, %v1872_v8 }
 0x928   :  { %v2226_v7 = vpop.eup %2225  ;;  %v1924_v57 = vadd.f32 %v1920_v60, %v59_v26 }
 0x929   :  { %v1874_v46 = vmul.f32 %v2224_v34, %v1873_v18  ;;  %v1890_v4 = vmul.f32 %v2226_v7, %v1867_v22  ;;  %vm1896_vm5 = vweird.f32 %v2226_v7 }
 0x92a   :  { %1932 = vrot.lane.b32.xlu2 %v1924_v57, %s2228_s24  ;;  %vm1897_vm7 = vmor %vm1895_vm6, %vm1896_vm5 }
 0x92b   :  { %v1878_v2 = vsel %vm1877_vm4, %v2224_v34, %v1874_v46  ;;  %v1891_v31 = vmul.f32 %v2226_v7, %v1890_v4 }
 0x92c   :  { %v1909_v49 = vmul.f32 %v1878_v2, %v3001_v5 }
 0x92d   :  { %v1892_v55 = vmul.f32 0.5, %v1891_v31 }
 0x92e   :  { %v1917_v52 = vmul.f32 %v1915_v58, %v1909_v49 }
 0x92f   :  { %v1893_v53 = vsub.f32 1.5, %v1892_v55 }
 0x930   :  { %v1921_v36 = vadd.f32 %v1917_v52, %v59_v26 }
 0x931   :  { %v1894_v33 = vmul.f32 %v2226_v7, %v1893_v53 }
 0x933   :  { %v1898_v45 = vsel %vm1897_vm7, %v2226_v7, %v1894_v33 }
 0x934   :  { %v1911_v50 = vmul.f32 %v1898_v45, %v3006_v51 }
 0x936   :  { %v1919_v56 = vmul.f32 %v1915_v58, %v1911_v50 }
 0x938   :  { %v1923_v59 = vadd.f32 %v1919_v56, %v59_v26 }
 0x96d   :  { %v1927_v48 = vpop.permute.xlu1 %1926 }
 0x96e   :  { %v1929_v62 = vsel %vm88_vm0, %v1921_v36, %v1927_v48 }
 0x96f   :  { %1930 = vst [vmem:[%s3030_s3] sm:$0xff] %v1929_v62 }
 0x984   :  { %v1933_v5 = vpop.permute.xlu2 %1932 }
 0x985   :  { %v1935_v6 = vsel %vm88_vm0, %v1923_v59, %v1933_v5 }
 0x986   :  { %2097 = vst [vmem:[%s3030_s3 + $0x8] sm:$0xff] %v1935_v6 }

</bundles_post_ra>
